<compile_context>
chip_gen: v7x
topology: tpu7x:2x2x1
jax: 0.10.0
libtpu: 0.0.40
codegen_flags: <defaults>
</compile_context>

<pallas_src>
import math

import jax
import jax.numpy as jnp
from jax import lax
from jax.experimental import pallas as pl
from jax.experimental.pallas import tpu as pltpu

# ---------------- small, self-consistent config ----------------
VOCAB = 100
MAX_POS = 16
B = 2            # batch
S = 8            # sequence length
D = 32           # transformer.config.dim
H = 4            # attention heads
HD = D // H      # head dim
FF = 64          # FFN hidden dim
N_LAYERS = 2
HIDDEN = 32      # clf hidden_size (module default 512; small shapes here)
NUM_CLASSES = 8
LN_EPS = 1e-12
NEG_INF = -1e9


# ---------------- in-kernel helpers ----------------
def _layernorm(x, g, b, eps=LN_EPS):
    mu = jnp.mean(x, axis=-1, keepdims=True)
    var = jnp.mean((x - mu) ** 2, axis=-1, keepdims=True)
    return (x - mu) * lax.rsqrt(var + eps) * g + b


def _gelu(x):
    # TODO(synk): DistilBERT uses exact erf-GELU; tanh approximation used here.
    c = math.sqrt(2.0 / math.pi)
    return 0.5 * x * (1.0 + jnp.tanh(c * (x + 0.044715 * x * x * x)))


# ---------------- single fused forward kernel ----------------
def fused_fwd_kernel(emb_ref,      # (B*S, D)  word+pos embeddings (pre-LN)
                     amask_ref,    # (B, S)    additive key mask: 0 keep / -1e9 pad
                     hmask_ref,    # (H*S, D)  per-head feature mask (0/1)
                     pool_ref,     # (B, B*S)  mean-pool matrix (1/S in own batch rows)
                     embln_ref,    # (2, D)    [gamma; beta] of embedding LayerNorm
                     wqkv_ref,     # (L, D, 3D)  packed Q|K|V weights (Q pre-scaled)
                     bqkv_ref,     # (L, 1, 3D)  packed Q|K|V bias   (Q pre-scaled)
                     wo_ref,       # (L, D, D)
                     w1_ref,       # (L, D, FF)
                     b1_ref,       # (L, 1, FF)
                     w2_ref,       # (L, FF, D)
                     vecd_ref,     # (L, 6, D)  [bo, ln1_g, ln1_b, b2, ln2_g, ln2_b]
                     cw1_ref,      # (D, HIDDEN)
                     cb1_ref,      # (1, HIDDEN)
                     cw2_ref,      # (HIDDEN, NUM_CLASSES)
                     cb2_ref,      # (1, NUM_CLASSES)
                     o_ref):       # (B, NUM_CLASSES)
    embln = embln_ref[...]
    x = _layernorm(emb_ref[...], embln[0:1, :], embln[1:2, :])       # (B*S, D)

    hmask = hmask_ref[...]                                           # (H*S, D)
    amask = amask_ref[...]                                           # (B, S)

    for l in range(N_LAYERS):                                        # unrolled layer loop
        # ---- fused QKV projection (single MXU push) ----
        qkv = jnp.dot(x, wqkv_ref[l],
                      preferred_element_type=jnp.float32) + bqkv_ref[l]   # (B*S, 3D)
        q = qkv[:, 0:D]            # 1/sqrt(HD) already folded into Wq / bq
        k = qkv[:, D:2 * D]
        v = qkv[:, 2 * D:3 * D]

        # ---- attention, per batch element (B=2, unrolled) ----
        ctx_blocks = []
        for b in range(B):
            r = b * S
            qb = q[r:r + S, :]                                        # (S, D)
            kb = k[r:r + S, :]
            vb = v[r:r + S, :]
            # Replicate queries per head along sublanes and zero the other
            # heads' features: one matmul yields all H heads' score blocks.
            q_rep = jnp.concatenate([qb] * H, axis=0) * hmask          # (H*S, D)
            s = lax.dot_general(q_rep, kb, (((1,), (1,)), ((), ())),
                                preferred_element_type=jnp.float32)    # (H*S, S)
            s = s + amask[b:b + 1, :]                                  # key padding mask
            s = s - jnp.max(s, axis=-1, keepdims=True)
            p = jnp.exp(s)
            p = p * pl.reciprocal(jnp.sum(p, axis=-1, keepdims=True), approx=True)
            ctx_all = jnp.dot(p, vb,
                              preferred_element_type=jnp.float32) * hmask  # (H*S, D)
            ctx_b = ctx_all[0:S, :]
            for h in range(1, H):
                ctx_b = ctx_b + ctx_all[h * S:(h + 1) * S, :]          # head recombine
            ctx_blocks.append(ctx_b)
        ctx = jnp.concatenate(ctx_blocks, axis=0)                      # (B*S, D)

        vec = vecd_ref[l]                                              # (6, D)
        attn_out = jnp.dot(ctx, wo_ref[l],
                           preferred_element_type=jnp.float32) + vec[0:1, :]
        x = _layernorm(x + attn_out, vec[1:2, :], vec[2:3, :])         # sa_layer_norm

        hmid = _gelu(jnp.dot(x, w1_ref[l],
                             preferred_element_type=jnp.float32) + b1_ref[l])
        ffn = jnp.dot(hmid, w2_ref[l],
                      preferred_element_type=jnp.float32) + vec[3:4, :]
        x = _layernorm(x + ffn, vec[4:5, :], vec[5:6, :])              # output_layer_norm

    # ---- classifier head: mean pool (matmul), dense1, relu, dropout=id, dense2 ----
    pooled = jnp.dot(pool_ref[...], x, preferred_element_type=jnp.float32)  # (B, D)
    z = jnp.dot(pooled, cw1_ref[...], preferred_element_type=jnp.float32) + cb1_ref[...]
    z = jnp.maximum(z, 0.0)
    o_ref[...] = jnp.dot(z, cw2_ref[...],
                         preferred_element_type=jnp.float32) + cb2_ref[...]


# ---------------- pallas_call wrapper ----------------
def _full_spec(a):
    nd = a.ndim
    return pl.BlockSpec(a.shape, lambda i, _n=nd: (0,) * _n)


@jax.jit
def forward(input_ids, attention_mask, packed):
    seq = input_ids.shape[1]
    # embedding gather (plain-JAX glue; no clean Pallas equivalent for table lookup)
    emb = (packed["word_emb"][input_ids]
           + packed["pos_emb"][jnp.arange(seq)][None, :, :]).astype(jnp.float32)
    emb = emb.reshape(B * S, D)
    amask = jnp.where(attention_mask > 0, 0.0, NEG_INF).astype(jnp.float32)   # (B, S)

    operands = (emb, amask, packed["head_mask"], packed["pool"], packed["emb_ln"],
                packed["wqkv"], packed["bqkv"], packed["wo"], packed["w1"],
                packed["b1"], packed["w2"], packed["vecd"],
                packed["cw1"], packed["cb1"], packed["cw2"], packed["cb2"])

    return pl.pallas_call(
        fused_fwd_kernel,
        out_shape=jax.ShapeDtypeStruct((B, NUM_CLASSES), jnp.float32),
        grid=(1,),
        in_specs=[_full_spec(a) for a in operands],
        out_specs=pl.BlockSpec((B, NUM_CLASSES), lambda i: (0, 0)),
        compiler_params=pltpu.CompilerParams(dimension_semantics=("arbitrary",)),
    )(*operands)


# ---------------- deterministic synthetic params ----------------
def init_params(key):
    def nrm(k, shape, std=0.02):
        return std * jax.random.normal(k, shape, jnp.float32)

    keys = jax.random.split(key, 4 + N_LAYERS)
    params = {
        "word_emb": nrm(keys[0], (VOCAB, D)),
        "pos_emb": nrm(keys[1], (MAX_POS, D)),
        "emb_ln_g": jnp.ones((D,), jnp.float32),
        "emb_ln_b": jnp.zeros((D,), jnp.float32),
        "W1": nrm(keys[2], (D, HIDDEN)),
        "b1c": jnp.zeros((HIDDEN,), jnp.float32),
        "W2": nrm(keys[3], (HIDDEN, NUM_CLASSES)),
        "b2c": jnp.zeros((NUM_CLASSES,), jnp.float32),
        "layers": [],
    }
    for l in range(N_LAYERS):
        lk = jax.random.split(keys[4 + l], 6)
        params["layers"].append({
            "wq": nrm(lk[0], (D, D)), "bq": jnp.zeros((D,), jnp.float32),
            "wk": nrm(lk[1], (D, D)), "bk": jnp.zeros((D,), jnp.float32),
            "wv": nrm(lk[2], (D, D)), "bv": jnp.zeros((D,), jnp.float32),
            "wo": nrm(lk[3], (D, D)), "bo": jnp.zeros((D,), jnp.float32),
            "ln1_g": jnp.ones((D,), jnp.float32), "ln1_b": jnp.zeros((D,), jnp.float32),
            "w1": nrm(lk[4], (D, FF)), "b1": jnp.zeros((FF,), jnp.float32),
            "w2": nrm(lk[5], (FF, D)), "b2": jnp.zeros((D,), jnp.float32),
            "ln2_g": jnp.ones((D,), jnp.float32), "ln2_b": jnp.zeros((D,), jnp.float32),
        })
    return params


def pack_params(params):
    """One-time host-side consolidation of weights into lane-aligned stacks."""
    scale = 1.0 / math.sqrt(HD)
    wqkv, bqkv, wo, w1, b1, w2, vecd = [], [], [], [], [], [], []
    for lp in params["layers"]:
        # fold 1/sqrt(HD) attention scale into Q weights / bias (exactly equivalent)
        wqkv.append(jnp.concatenate([lp["wq"] * scale, lp["wk"], lp["wv"]], axis=1))
        bqkv.append(jnp.concatenate([lp["bq"] * scale, lp["bk"], lp["bv"]])[None, :])
        wo.append(lp["wo"])
        w1.append(lp["w1"])
        b1.append(lp["b1"][None, :])
        w2.append(lp["w2"])
        vecd.append(jnp.stack([lp["bo"], lp["ln1_g"], lp["ln1_b"],
                               lp["b2"], lp["ln2_g"], lp["ln2_b"]], axis=0))

    # (H*S, D) head mask: row h*S+i keeps only head h's feature columns
    rows_head = jnp.repeat(jnp.arange(H), S)
    cols_head = jnp.arange(D) // HD
    head_mask = (rows_head[:, None] == cols_head[None, :]).astype(jnp.float32)

    # (B, B*S) mean-pool matrix: pool[b, b*S + i] = 1/S
    pool = (jnp.arange(B)[:, None]
            == jnp.repeat(jnp.arange(B), S)[None, :]).astype(jnp.float32) / S

    return {
        "word_emb": params["word_emb"],
        "pos_emb": params["pos_emb"],
        "emb_ln": jnp.stack([params["emb_ln_g"], params["emb_ln_b"]], axis=0),
        "wqkv": jnp.stack(wqkv), "bqkv": jnp.stack(bqkv), "wo": jnp.stack(wo),
        "w1": jnp.stack(w1), "b1": jnp.stack(b1), "w2": jnp.stack(w2),
        "vecd": jnp.stack(vecd),
        "cw1": params["W1"], "cb1": params["b1c"][None, :],
        "cw2": params["W2"], "cb2": params["b2c"][None, :],
        "head_mask": head_mask, "pool": pool,
    }


if __name__ == "__main__":
    key = jax.random.PRNGKey(0)
    pkey, ikey = jax.random.split(key)
    params = init_params(pkey)
    packed = pack_params(params)

    input_ids = jax.random.randint(ikey, (B, S), 0, VOCAB, dtype=jnp.int32)
    attention_mask = jnp.array([[1] * S,
                                [1] * (S - 3) + [0] * 3], dtype=jnp.int32)

    logits = forward(input_ids, attention_mask, packed)
    logits = jax.block_until_ready(logits)
    assert logits.shape == (B, NUM_CLASSES)
    assert bool(jnp.all(jnp.isfinite(logits)))
    print("KERNEL_OK")
</pallas_src>

<mosaic_0001>
module attributes {stable_mosaic.version = 11 : i64} {
  func.func @fused_fwd_kernel(%arg0: i32, %arg1: memref<16x32xf32, #tpu.memory_space<vmem>>, %arg2: memref<2x8xf32, #tpu.memory_space<vmem>>, %arg3: memref<32x32xf32, #tpu.memory_space<vmem>>, %arg4: memref<2x16xf32, #tpu.memory_space<vmem>>, %arg5: memref<2x32xf32, #tpu.memory_space<vmem>>, %arg6: memref<2x32x96xf32, #tpu.memory_space<vmem>>, %arg7: memref<2x1x96xf32, #tpu.memory_space<vmem>>, %arg8: memref<2x32x32xf32, #tpu.memory_space<vmem>>, %arg9: memref<2x32x64xf32, #tpu.memory_space<vmem>>, %arg10: memref<2x1x64xf32, #tpu.memory_space<vmem>>, %arg11: memref<2x64x32xf32, #tpu.memory_space<vmem>>, %arg12: memref<2x6x32xf32, #tpu.memory_space<vmem>>, %arg13: memref<32x32xf32, #tpu.memory_space<vmem>>, %arg14: memref<1x32xf32, #tpu.memory_space<vmem>>, %arg15: memref<32x8xf32, #tpu.memory_space<vmem>>, %arg16: memref<1x8xf32, #tpu.memory_space<vmem>>, %arg17: memref<2x8xf32, #tpu.memory_space<vmem>>) attributes {dimension_semantics = [#tpu.dimension_semantics<arbitrary>], iteration_bounds = array<i64: 1>, scalar_prefetch = 0 : i64, scratch_operands = 0 : i64, tpu.core_type = #tpu.core_type<tc>, window_params = [{pipeline_mode = #tpu.pipeline_mode<synchronous>, transform_indices = @transform_0, window_bounds = array<i64: 16, 32>}, {pipeline_mode = #tpu.pipeline_mode<synchronous>, transform_indices = @transform_1, window_bounds = array<i64: 2, 8>}, {pipeline_mode = #tpu.pipeline_mode<synchronous>, transform_indices = @transform_2, window_bounds = array<i64: 32, 32>}, {pipeline_mode = #tpu.pipeline_mode<synchronous>, transform_indices = @transform_3, window_bounds = array<i64: 2, 16>}, {pipeline_mode = #tpu.pipeline_mode<synchronous>, transform_indices = @transform_4, window_bounds = array<i64: 2, 32>}, {pipeline_mode = #tpu.pipeline_mode<synchronous>, transform_indices = @transform_5, window_bounds = array<i64: 2, 32, 96>}, {pipeline_mode = #tpu.pipeline_mode<synchronous>, transform_indices = @transform_6, window_bounds = array<i64: 2, 1, 96>}, {pipeline_mode = #tpu.pipeline_mode<synchronous>, transform_indices = @transform_7, window_bounds = array<i64: 2, 32, 32>}, {pipeline_mode = #tpu.pipeline_mode<synchronous>, transform_indices = @transform_8, window_bounds = array<i64: 2, 32, 64>}, {pipeline_mode = #tpu.pipeline_mode<synchronous>, transform_indices = @transform_9, window_bounds = array<i64: 2, 1, 64>}, {pipeline_mode = #tpu.pipeline_mode<synchronous>, transform_indices = @transform_10, window_bounds = array<i64: 2, 64, 32>}, {pipeline_mode = #tpu.pipeline_mode<synchronous>, transform_indices = @transform_11, window_bounds = array<i64: 2, 6, 32>}, {pipeline_mode = #tpu.pipeline_mode<synchronous>, transform_indices = @transform_12, window_bounds = array<i64: 32, 32>}, {pipeline_mode = #tpu.pipeline_mode<synchronous>, transform_indices = @transform_13, window_bounds = array<i64: 1, 32>}, {pipeline_mode = #tpu.pipeline_mode<synchronous>, transform_indices = @transform_14, window_bounds = array<i64: 32, 8>}, {pipeline_mode = #tpu.pipeline_mode<synchronous>, transform_indices = @transform_15, window_bounds = array<i64: 1, 8>}, {pipeline_mode = #tpu.pipeline_mode<synchronous>, transform_indices = @transform_16, window_bounds = array<i64: 2, 8>}]} {
    %c0 = arith.constant 0 : index
    %c0_0 = arith.constant 0 : index
    %0 = vector.load %arg5[%c0, %c0_0] : memref<2x32xf32, #tpu.memory_space<vmem>>, vector<2x32xf32>
    %c0_1 = arith.constant 0 : index
    %c0_2 = arith.constant 0 : index
    %1 = vector.load %arg1[%c0_1, %c0_2] : memref<16x32xf32, #tpu.memory_space<vmem>>, vector<16x32xf32>
    %2 = vector.extract_strided_slice %0 {offsets = [0, 0], sizes = [1, 32], strides = [1, 1]} : vector<2x32xf32> to vector<1x32xf32>
    %3 = vector.extract_strided_slice %0 {offsets = [1, 0], sizes = [1, 32], strides = [1, 1]} : vector<2x32xf32> to vector<1x32xf32>
    %cst = arith.constant dense<0.000000e+00> : vector<16xf32>
    %4 = vector.multi_reduction <add>, %1, %cst [1] : vector<16x32xf32> to vector<16xf32>
    %5 = vector.shape_cast %4 : vector<16xf32> to vector<16x1xf32>
    %cst_3 = arith.constant 3.200000e+01 : f32
    %6 = vector.broadcast %cst_3 : f32 to vector<16x1xf32>
    %7 = arith.divf %5, %6 : vector<16x1xf32>
    %8 = vector.broadcast %7 : vector<16x1xf32> to vector<16x32xf32>
    %9 = arith.subf %1, %8 : vector<16x32xf32>
    %10 = arith.mulf %9, %9 : vector<16x32xf32>
    %cst_4 = arith.constant dense<0.000000e+00> : vector<16xf32>
    %11 = vector.multi_reduction <add>, %10, %cst_4 [1] : vector<16x32xf32> to vector<16xf32>
    %12 = vector.shape_cast %11 : vector<16xf32> to vector<16x1xf32>
    %cst_5 = arith.constant 3.200000e+01 : f32
    %13 = vector.broadcast %cst_5 : f32 to vector<16x1xf32>
    %14 = arith.divf %12, %13 : vector<16x1xf32>
    %15 = vector.broadcast %7 : vector<16x1xf32> to vector<16x32xf32>
    %16 = arith.subf %1, %15 : vector<16x32xf32>
    %cst_6 = arith.constant 9.99999996E-13 : f32
    %17 = vector.broadcast %cst_6 : f32 to vector<16x1xf32>
    %18 = arith.addf %14, %17 : vector<16x1xf32>
    %19 = math.rsqrt %18 : vector<16x1xf32>
    %20 = vector.broadcast %19 : vector<16x1xf32> to vector<16x32xf32>
    %21 = arith.mulf %16, %20 : vector<16x32xf32>
    %22 = vector.broadcast %2 : vector<1x32xf32> to vector<16x32xf32>
    %23 = arith.mulf %21, %22 : vector<16x32xf32>
    %24 = vector.broadcast %3 : vector<1x32xf32> to vector<16x32xf32>
    %25 = arith.addf %23, %24 : vector<16x32xf32>
    %c0_7 = arith.constant 0 : index
    %c0_8 = arith.constant 0 : index
    %26 = vector.load %arg3[%c0_7, %c0_8] : memref<32x32xf32, #tpu.memory_space<vmem>>, vector<32x32xf32>
    %c0_9 = arith.constant 0 : index
    %c0_10 = arith.constant 0 : index
    %27 = vector.load %arg2[%c0_9, %c0_10] : memref<2x8xf32, #tpu.memory_space<vmem>>, vector<2x8xf32>
    %c0_11 = arith.constant 0 : index
    %c0_12 = arith.constant 0 : index
    %c0_13 = arith.constant 0 : index
    %28 = vector.load %arg6[%c0_11, %c0_12, %c0_13] : memref<2x32x96xf32, #tpu.memory_space<vmem>>, vector<1x32x96xf32>
    %29 = vector.shape_cast %28 : vector<1x32x96xf32> to vector<32x96xf32>
    %cst_14 = arith.constant dense<0.000000e+00> : vector<16x96xf32>
    %30 = tpu.matmul %25, %29, %cst_14 {dimension_numbers = #tpu.dot_dimension_numbers<[1], [0], [0], [1], [0, 0, 1, 1], [], []>} : vector<16x32xf32>, vector<32x96xf32>, vector<16x96xf32> -> vector<16x96xf32>
    %c0_15 = arith.constant 0 : index
    %c0_16 = arith.constant 0 : index
    %c0_17 = arith.constant 0 : index
    %31 = vector.load %arg7[%c0_15, %c0_16, %c0_17] : memref<2x1x96xf32, #tpu.memory_space<vmem>>, vector<1x1x96xf32>
    %32 = vector.shape_cast %31 : vector<1x1x96xf32> to vector<1x96xf32>
    %33 = vector.broadcast %32 : vector<1x96xf32> to vector<16x96xf32>
    %34 = arith.addf %30, %33 : vector<16x96xf32>
    %35 = vector.extract_strided_slice %34 {offsets = [0, 0], sizes = [16, 32], strides = [1, 1]} : vector<16x96xf32> to vector<16x32xf32>
    %36 = vector.extract_strided_slice %34 {offsets = [0, 32], sizes = [16, 32], strides = [1, 1]} : vector<16x96xf32> to vector<16x32xf32>
    %37 = vector.extract_strided_slice %34 {offsets = [0, 64], sizes = [16, 32], strides = [1, 1]} : vector<16x96xf32> to vector<16x32xf32>
    %38 = vector.extract_strided_slice %35 {offsets = [0, 0], sizes = [8, 32], strides = [1, 1]} : vector<16x32xf32> to vector<8x32xf32>
    %39 = vector.extract_strided_slice %36 {offsets = [0, 0], sizes = [8, 32], strides = [1, 1]} : vector<16x32xf32> to vector<8x32xf32>
    %40 = vector.extract_strided_slice %37 {offsets = [0, 0], sizes = [8, 32], strides = [1, 1]} : vector<16x32xf32> to vector<8x32xf32>
    %41 = tpu.concatenate %38, %38, %38, %38 in 0 : vector<8x32xf32>, vector<8x32xf32>, vector<8x32xf32>, vector<8x32xf32> -> vector<32x32xf32>
    %42 = arith.mulf %41, %26 : vector<32x32xf32>
    %cst_18 = arith.constant dense<0.000000e+00> : vector<32x8xf32>
    %43 = tpu.matmul %42, %39, %cst_18 {dimension_numbers = #tpu.dot_dimension_numbers<[1], [1], [0], [0], [0, 0, 1, 0], [], []>} : vector<32x32xf32>, vector<8x32xf32>, vector<32x8xf32> -> vector<32x8xf32>
    %44 = vector.extract_strided_slice %27 {offsets = [0, 0], sizes = [1, 8], strides = [1, 1]} : vector<2x8xf32> to vector<1x8xf32>
    %45 = vector.broadcast %44 : vector<1x8xf32> to vector<32x8xf32>
    %46 = arith.addf %43, %45 : vector<32x8xf32>
    %cst_19 = arith.constant dense<0xFF800000> : vector<32xf32>
    %47 = vector.multi_reduction <maximumf>, %46, %cst_19 [1] : vector<32x8xf32> to vector<32xf32>
    %48 = vector.shape_cast %47 : vector<32xf32> to vector<32x1xf32>
    %49 = vector.broadcast %48 : vector<32x1xf32> to vector<32x8xf32>
    %50 = arith.subf %46, %49 : vector<32x8xf32>
    %51 = math.exp %50 : vector<32x8xf32>
    %cst_20 = arith.constant dense<0.000000e+00> : vector<32xf32>
    %52 = vector.multi_reduction <add>, %51, %cst_20 [1] : vector<32x8xf32> to vector<32xf32>
    %53 = vector.shape_cast %52 : vector<32xf32> to vector<32x1xf32>
    %54 = tpu.reciprocal %53 {approx = true} : vector<32x1xf32> -> vector<32x1xf32>
    %55 = vector.broadcast %54 : vector<32x1xf32> to vector<32x8xf32>
    %56 = arith.mulf %51, %55 : vector<32x8xf32>
    %cst_21 = arith.constant dense<0.000000e+00> : vector<32x32xf32>
    %57 = tpu.matmul %56, %40, %cst_21 {dimension_numbers = #tpu.dot_dimension_numbers<[1], [0], [0], [1], [0, 0, 1, 1], [], []>} : vector<32x8xf32>, vector<8x32xf32>, vector<32x32xf32> -> vector<32x32xf32>
    %58 = arith.mulf %57, %26 : vector<32x32xf32>
    %59 = vector.extract_strided_slice %58 {offsets = [0, 0], sizes = [8, 32], strides = [1, 1]} : vector<32x32xf32> to vector<8x32xf32>
    %60 = vector.extract_strided_slice %58 {offsets = [8, 0], sizes = [8, 32], strides = [1, 1]} : vector<32x32xf32> to vector<8x32xf32>
    %61 = arith.addf %59, %60 : vector<8x32xf32>
    %62 = vector.extract_strided_slice %58 {offsets = [16, 0], sizes = [8, 32], strides = [1, 1]} : vector<32x32xf32> to vector<8x32xf32>
    %63 = arith.addf %61, %62 : vector<8x32xf32>
    %64 = vector.extract_strided_slice %58 {offsets = [24, 0], sizes = [8, 32], strides = [1, 1]} : vector<32x32xf32> to vector<8x32xf32>
    %65 = arith.addf %63, %64 : vector<8x32xf32>
    %66 = vector.extract_strided_slice %35 {offsets = [8, 0], sizes = [8, 32], strides = [1, 1]} : vector<16x32xf32> to vector<8x32xf32>
    %67 = vector.extract_strided_slice %36 {offsets = [8, 0], sizes = [8, 32], strides = [1, 1]} : vector<16x32xf32> to vector<8x32xf32>
    %68 = vector.extract_strided_slice %37 {offsets = [8, 0], sizes = [8, 32], strides = [1, 1]} : vector<16x32xf32> to vector<8x32xf32>
    %69 = tpu.concatenate %66, %66, %66, %66 in 0 : vector<8x32xf32>, vector<8x32xf32>, vector<8x32xf32>, vector<8x32xf32> -> vector<32x32xf32>
    %70 = arith.mulf %69, %26 : vector<32x32xf32>
    %cst_22 = arith.constant dense<0.000000e+00> : vector<32x8xf32>
    %71 = tpu.matmul %70, %67, %cst_22 {dimension_numbers = #tpu.dot_dimension_numbers<[1], [1], [0], [0], [0, 0, 1, 0], [], []>} : vector<32x32xf32>, vector<8x32xf32>, vector<32x8xf32> -> vector<32x8xf32>
    %72 = vector.extract_strided_slice %27 {offsets = [1, 0], sizes = [1, 8], strides = [1, 1]} : vector<2x8xf32> to vector<1x8xf32>
    %73 = vector.broadcast %72 : vector<1x8xf32> to vector<32x8xf32>
    %74 = arith.addf %71, %73 : vector<32x8xf32>
    %cst_23 = arith.constant dense<0xFF800000> : vector<32xf32>
    %75 = vector.multi_reduction <maximumf>, %74, %cst_23 [1] : vector<32x8xf32> to vector<32xf32>
    %76 = vector.shape_cast %75 : vector<32xf32> to vector<32x1xf32>
    %77 = vector.broadcast %76 : vector<32x1xf32> to vector<32x8xf32>
    %78 = arith.subf %74, %77 : vector<32x8xf32>
    %79 = math.exp %78 : vector<32x8xf32>
    %cst_24 = arith.constant dense<0.000000e+00> : vector<32xf32>
    %80 = vector.multi_reduction <add>, %79, %cst_24 [1] : vector<32x8xf32> to vector<32xf32>
    %81 = vector.shape_cast %80 : vector<32xf32> to vector<32x1xf32>
    %82 = tpu.reciprocal %81 {approx = true} : vector<32x1xf32> -> vector<32x1xf32>
    %83 = vector.broadcast %82 : vector<32x1xf32> to vector<32x8xf32>
    %84 = arith.mulf %79, %83 : vector<32x8xf32>
    %cst_25 = arith.constant dense<0.000000e+00> : vector<32x32xf32>
    %85 = tpu.matmul %84, %68, %cst_25 {dimension_numbers = #tpu.dot_dimension_numbers<[1], [0], [0], [1], [0, 0, 1, 1], [], []>} : vector<32x8xf32>, vector<8x32xf32>, vector<32x32xf32> -> vector<32x32xf32>
    %86 = arith.mulf %85, %26 : vector<32x32xf32>
    %87 = vector.extract_strided_slice %86 {offsets = [0, 0], sizes = [8, 32], strides = [1, 1]} : vector<32x32xf32> to vector<8x32xf32>
    %88 = vector.extract_strided_slice %86 {offsets = [8, 0], sizes = [8, 32], strides = [1, 1]} : vector<32x32xf32> to vector<8x32xf32>
    %89 = arith.addf %87, %88 : vector<8x32xf32>
    %90 = vector.extract_strided_slice %86 {offsets = [16, 0], sizes = [8, 32], strides = [1, 1]} : vector<32x32xf32> to vector<8x32xf32>
    %91 = arith.addf %89, %90 : vector<8x32xf32>
    %92 = vector.extract_strided_slice %86 {offsets = [24, 0], sizes = [8, 32], strides = [1, 1]} : vector<32x32xf32> to vector<8x32xf32>
    %93 = arith.addf %91, %92 : vector<8x32xf32>
    %94 = tpu.concatenate %65, %93 in 0 : vector<8x32xf32>, vector<8x32xf32> -> vector<16x32xf32>
    %c0_26 = arith.constant 0 : index
    %c0_27 = arith.constant 0 : index
    %c0_28 = arith.constant 0 : index
    %95 = vector.load %arg12[%c0_26, %c0_27, %c0_28] : memref<2x6x32xf32, #tpu.memory_space<vmem>>, vector<1x6x32xf32>
    %96 = vector.shape_cast %95 : vector<1x6x32xf32> to vector<6x32xf32>
    %c0_29 = arith.constant 0 : index
    %c0_30 = arith.constant 0 : index
    %c0_31 = arith.constant 0 : index
    %97 = vector.load %arg8[%c0_29, %c0_30, %c0_31] : memref<2x32x32xf32, #tpu.memory_space<vmem>>, vector<1x32x32xf32>
    %98 = vector.shape_cast %97 : vector<1x32x32xf32> to vector<32x32xf32>
    %cst_32 = arith.constant dense<0.000000e+00> : vector<16x32xf32>
    %99 = tpu.matmul %94, %98, %cst_32 {dimension_numbers = #tpu.dot_dimension_numbers<[1], [0], [0], [1], [0, 0, 1, 1], [], []>} : vector<16x32xf32>, vector<32x32xf32>, vector<16x32xf32> -> vector<16x32xf32>
    %100 = vector.extract_strided_slice %96 {offsets = [0, 0], sizes = [1, 32], strides = [1, 1]} : vector<6x32xf32> to vector<1x32xf32>
    %101 = vector.broadcast %100 : vector<1x32xf32> to vector<16x32xf32>
    %102 = arith.addf %99, %101 : vector<16x32xf32>
    %103 = arith.addf %25, %102 : vector<16x32xf32>
    %104 = vector.extract_strided_slice %96 {offsets = [1, 0], sizes = [1, 32], strides = [1, 1]} : vector<6x32xf32> to vector<1x32xf32>
    %105 = vector.extract_strided_slice %96 {offsets = [2, 0], sizes = [1, 32], strides = [1, 1]} : vector<6x32xf32> to vector<1x32xf32>
    %cst_33 = arith.constant dense<0.000000e+00> : vector<16xf32>
    %106 = vector.multi_reduction <add>, %103, %cst_33 [1] : vector<16x32xf32> to vector<16xf32>
    %107 = vector.shape_cast %106 : vector<16xf32> to vector<16x1xf32>
    %cst_34 = arith.constant 3.200000e+01 : f32
    %108 = vector.broadcast %cst_34 : f32 to vector<16x1xf32>
    %109 = arith.divf %107, %108 : vector<16x1xf32>
    %110 = vector.broadcast %109 : vector<16x1xf32> to vector<16x32xf32>
    %111 = arith.subf %103, %110 : vector<16x32xf32>
    %112 = arith.mulf %111, %111 : vector<16x32xf32>
    %cst_35 = arith.constant dense<0.000000e+00> : vector<16xf32>
    %113 = vector.multi_reduction <add>, %112, %cst_35 [1] : vector<16x32xf32> to vector<16xf32>
    %114 = vector.shape_cast %113 : vector<16xf32> to vector<16x1xf32>
    %cst_36 = arith.constant 3.200000e+01 : f32
    %115 = vector.broadcast %cst_36 : f32 to vector<16x1xf32>
    %116 = arith.divf %114, %115 : vector<16x1xf32>
    %117 = vector.broadcast %109 : vector<16x1xf32> to vector<16x32xf32>
    %118 = arith.subf %103, %117 : vector<16x32xf32>
    %cst_37 = arith.constant 9.99999996E-13 : f32
    %119 = vector.broadcast %cst_37 : f32 to vector<16x1xf32>
    %120 = arith.addf %116, %119 : vector<16x1xf32>
    %121 = math.rsqrt %120 : vector<16x1xf32>
    %122 = vector.broadcast %121 : vector<16x1xf32> to vector<16x32xf32>
    %123 = arith.mulf %118, %122 : vector<16x32xf32>
    %124 = vector.broadcast %104 : vector<1x32xf32> to vector<16x32xf32>
    %125 = arith.mulf %123, %124 : vector<16x32xf32>
    %126 = vector.broadcast %105 : vector<1x32xf32> to vector<16x32xf32>
    %127 = arith.addf %125, %126 : vector<16x32xf32>
    %c0_38 = arith.constant 0 : index
    %c0_39 = arith.constant 0 : index
    %c0_40 = arith.constant 0 : index
    %128 = vector.load %arg9[%c0_38, %c0_39, %c0_40] : memref<2x32x64xf32, #tpu.memory_space<vmem>>, vector<1x32x64xf32>
    %129 = vector.shape_cast %128 : vector<1x32x64xf32> to vector<32x64xf32>
    %cst_41 = arith.constant dense<0.000000e+00> : vector<16x64xf32>
    %130 = tpu.matmul %127, %129, %cst_41 {dimension_numbers = #tpu.dot_dimension_numbers<[1], [0], [0], [1], [0, 0, 1, 1], [], []>} : vector<16x32xf32>, vector<32x64xf32>, vector<16x64xf32> -> vector<16x64xf32>
    %c0_42 = arith.constant 0 : index
    %c0_43 = arith.constant 0 : index
    %c0_44 = arith.constant 0 : index
    %131 = vector.load %arg10[%c0_42, %c0_43, %c0_44] : memref<2x1x64xf32, #tpu.memory_space<vmem>>, vector<1x1x64xf32>
    %132 = vector.shape_cast %131 : vector<1x1x64xf32> to vector<1x64xf32>
    %133 = vector.broadcast %132 : vector<1x64xf32> to vector<16x64xf32>
    %134 = arith.addf %130, %133 : vector<16x64xf32>
    %cst_45 = arith.constant 5.000000e-01 : f32
    %135 = vector.broadcast %cst_45 : f32 to vector<16x64xf32>
    %136 = arith.mulf %135, %134 : vector<16x64xf32>
    %cst_46 = arith.constant 4.471500e-02 : f32
    %137 = vector.broadcast %cst_46 : f32 to vector<16x64xf32>
    %138 = arith.mulf %137, %134 : vector<16x64xf32>
    %139 = arith.mulf %138, %134 : vector<16x64xf32>
    %140 = arith.mulf %139, %134 : vector<16x64xf32>
    %141 = arith.addf %134, %140 : vector<16x64xf32>
    %cst_47 = arith.constant 0.797884583 : f32
    %142 = vector.broadcast %cst_47 : f32 to vector<16x64xf32>
    %143 = arith.mulf %142, %141 : vector<16x64xf32>
    %144 = math.tanh %143 : vector<16x64xf32>
    %cst_48 = arith.constant 1.000000e+00 : f32
    %145 = vector.broadcast %cst_48 : f32 to vector<16x64xf32>
    %146 = arith.addf %145, %144 : vector<16x64xf32>
    %147 = arith.mulf %136, %146 : vector<16x64xf32>
    %c0_49 = arith.constant 0 : index
    %c0_50 = arith.constant 0 : index
    %c0_51 = arith.constant 0 : index
    %148 = vector.load %arg11[%c0_49, %c0_50, %c0_51] : memref<2x64x32xf32, #tpu.memory_space<vmem>>, vector<1x64x32xf32>
    %149 = vector.shape_cast %148 : vector<1x64x32xf32> to vector<64x32xf32>
    %cst_52 = arith.constant dense<0.000000e+00> : vector<16x32xf32>
    %150 = tpu.matmul %147, %149, %cst_52 {dimension_numbers = #tpu.dot_dimension_numbers<[1], [0], [0], [1], [0, 0, 1, 1], [], []>} : vector<16x64xf32>, vector<64x32xf32>, vector<16x32xf32> -> vector<16x32xf32>
    %151 = vector.extract_strided_slice %96 {offsets = [3, 0], sizes = [1, 32], strides = [1, 1]} : vector<6x32xf32> to vector<1x32xf32>
    %152 = vector.broadcast %151 : vector<1x32xf32> to vector<16x32xf32>
    %153 = arith.addf %150, %152 : vector<16x32xf32>
    %154 = arith.addf %127, %153 : vector<16x32xf32>
    %155 = vector.extract_strided_slice %96 {offsets = [4, 0], sizes = [1, 32], strides = [1, 1]} : vector<6x32xf32> to vector<1x32xf32>
    %156 = vector.extract_strided_slice %96 {offsets = [5, 0], sizes = [1, 32], strides = [1, 1]} : vector<6x32xf32> to vector<1x32xf32>
    %cst_53 = arith.constant dense<0.000000e+00> : vector<16xf32>
    %157 = vector.multi_reduction <add>, %154, %cst_53 [1] : vector<16x32xf32> to vector<16xf32>
    %158 = vector.shape_cast %157 : vector<16xf32> to vector<16x1xf32>
    %cst_54 = arith.constant 3.200000e+01 : f32
    %159 = vector.broadcast %cst_54 : f32 to vector<16x1xf32>
    %160 = arith.divf %158, %159 : vector<16x1xf32>
    %161 = vector.broadcast %160 : vector<16x1xf32> to vector<16x32xf32>
    %162 = arith.subf %154, %161 : vector<16x32xf32>
    %163 = arith.mulf %162, %162 : vector<16x32xf32>
    %cst_55 = arith.constant dense<0.000000e+00> : vector<16xf32>
    %164 = vector.multi_reduction <add>, %163, %cst_55 [1] : vector<16x32xf32> to vector<16xf32>
    %165 = vector.shape_cast %164 : vector<16xf32> to vector<16x1xf32>
    %cst_56 = arith.constant 3.200000e+01 : f32
    %166 = vector.broadcast %cst_56 : f32 to vector<16x1xf32>
    %167 = arith.divf %165, %166 : vector<16x1xf32>
    %168 = vector.broadcast %160 : vector<16x1xf32> to vector<16x32xf32>
    %169 = arith.subf %154, %168 : vector<16x32xf32>
    %cst_57 = arith.constant 9.99999996E-13 : f32
    %170 = vector.broadcast %cst_57 : f32 to vector<16x1xf32>
    %171 = arith.addf %167, %170 : vector<16x1xf32>
    %172 = math.rsqrt %171 : vector<16x1xf32>
    %173 = vector.broadcast %172 : vector<16x1xf32> to vector<16x32xf32>
    %174 = arith.mulf %169, %173 : vector<16x32xf32>
    %175 = vector.broadcast %155 : vector<1x32xf32> to vector<16x32xf32>
    %176 = arith.mulf %174, %175 : vector<16x32xf32>
    %177 = vector.broadcast %156 : vector<1x32xf32> to vector<16x32xf32>
    %178 = arith.addf %176, %177 : vector<16x32xf32>
    %c1 = arith.constant 1 : index
    %c0_58 = arith.constant 0 : index
    %c0_59 = arith.constant 0 : index
    %179 = vector.load %arg6[%c1, %c0_58, %c0_59] : memref<2x32x96xf32, #tpu.memory_space<vmem>>, vector<1x32x96xf32>
    %180 = vector.shape_cast %179 : vector<1x32x96xf32> to vector<32x96xf32>
    %cst_60 = arith.constant dense<0.000000e+00> : vector<16x96xf32>
    %181 = tpu.matmul %178, %180, %cst_60 {dimension_numbers = #tpu.dot_dimension_numbers<[1], [0], [0], [1], [0, 0, 1, 1], [], []>} : vector<16x32xf32>, vector<32x96xf32>, vector<16x96xf32> -> vector<16x96xf32>
    %c1_61 = arith.constant 1 : index
    %c0_62 = arith.constant 0 : index
    %c0_63 = arith.constant 0 : index
    %182 = vector.load %arg7[%c1_61, %c0_62, %c0_63] : memref<2x1x96xf32, #tpu.memory_space<vmem>>, vector<1x1x96xf32>
    %183 = vector.shape_cast %182 : vector<1x1x96xf32> to vector<1x96xf32>
    %184 = vector.broadcast %183 : vector<1x96xf32> to vector<16x96xf32>
    %185 = arith.addf %181, %184 : vector<16x96xf32>
    %186 = vector.extract_strided_slice %185 {offsets = [0, 0], sizes = [16, 32], strides = [1, 1]} : vector<16x96xf32> to vector<16x32xf32>
    %187 = vector.extract_strided_slice %185 {offsets = [0, 32], sizes = [16, 32], strides = [1, 1]} : vector<16x96xf32> to vector<16x32xf32>
    %188 = vector.extract_strided_slice %185 {offsets = [0, 64], sizes = [16, 32], strides = [1, 1]} : vector<16x96xf32> to vector<16x32xf32>
    %189 = vector.extract_strided_slice %186 {offsets = [0, 0], sizes = [8, 32], strides = [1, 1]} : vector<16x32xf32> to vector<8x32xf32>
    %190 = vector.extract_strided_slice %187 {offsets = [0, 0], sizes = [8, 32], strides = [1, 1]} : vector<16x32xf32> to vector<8x32xf32>
    %191 = vector.extract_strided_slice %188 {offsets = [0, 0], sizes = [8, 32], strides = [1, 1]} : vector<16x32xf32> to vector<8x32xf32>
    %192 = tpu.concatenate %189, %189, %189, %189 in 0 : vector<8x32xf32>, vector<8x32xf32>, vector<8x32xf32>, vector<8x32xf32> -> vector<32x32xf32>
    %193 = arith.mulf %192, %26 : vector<32x32xf32>
    %cst_64 = arith.constant dense<0.000000e+00> : vector<32x8xf32>
    %194 = tpu.matmul %193, %190, %cst_64 {dimension_numbers = #tpu.dot_dimension_numbers<[1], [1], [0], [0], [0, 0, 1, 0], [], []>} : vector<32x32xf32>, vector<8x32xf32>, vector<32x8xf32> -> vector<32x8xf32>
    %195 = vector.extract_strided_slice %27 {offsets = [0, 0], sizes = [1, 8], strides = [1, 1]} : vector<2x8xf32> to vector<1x8xf32>
    %196 = vector.broadcast %195 : vector<1x8xf32> to vector<32x8xf32>
    %197 = arith.addf %194, %196 : vector<32x8xf32>
    %cst_65 = arith.constant dense<0xFF800000> : vector<32xf32>
    %198 = vector.multi_reduction <maximumf>, %197, %cst_65 [1] : vector<32x8xf32> to vector<32xf32>
    %199 = vector.shape_cast %198 : vector<32xf32> to vector<32x1xf32>
    %200 = vector.broadcast %199 : vector<32x1xf32> to vector<32x8xf32>
    %201 = arith.subf %197, %200 : vector<32x8xf32>
    %202 = math.exp %201 : vector<32x8xf32>
    %cst_66 = arith.constant dense<0.000000e+00> : vector<32xf32>
    %203 = vector.multi_reduction <add>, %202, %cst_66 [1] : vector<32x8xf32> to vector<32xf32>
    %204 = vector.shape_cast %203 : vector<32xf32> to vector<32x1xf32>
    %205 = tpu.reciprocal %204 {approx = true} : vector<32x1xf32> -> vector<32x1xf32>
    %206 = vector.broadcast %205 : vector<32x1xf32> to vector<32x8xf32>
    %207 = arith.mulf %202, %206 : vector<32x8xf32>
    %cst_67 = arith.constant dense<0.000000e+00> : vector<32x32xf32>
    %208 = tpu.matmul %207, %191, %cst_67 {dimension_numbers = #tpu.dot_dimension_numbers<[1], [0], [0], [1], [0, 0, 1, 1], [], []>} : vector<32x8xf32>, vector<8x32xf32>, vector<32x32xf32> -> vector<32x32xf32>
    %209 = arith.mulf %208, %26 : vector<32x32xf32>
    %210 = vector.extract_strided_slice %209 {offsets = [0, 0], sizes = [8, 32], strides = [1, 1]} : vector<32x32xf32> to vector<8x32xf32>
    %211 = vector.extract_strided_slice %209 {offsets = [8, 0], sizes = [8, 32], strides = [1, 1]} : vector<32x32xf32> to vector<8x32xf32>
    %212 = arith.addf %210, %211 : vector<8x32xf32>
    %213 = vector.extract_strided_slice %209 {offsets = [16, 0], sizes = [8, 32], strides = [1, 1]} : vector<32x32xf32> to vector<8x32xf32>
    %214 = arith.addf %212, %213 : vector<8x32xf32>
    %215 = vector.extract_strided_slice %209 {offsets = [24, 0], sizes = [8, 32], strides = [1, 1]} : vector<32x32xf32> to vector<8x32xf32>
    %216 = arith.addf %214, %215 : vector<8x32xf32>
    %217 = vector.extract_strided_slice %186 {offsets = [8, 0], sizes = [8, 32], strides = [1, 1]} : vector<16x32xf32> to vector<8x32xf32>
    %218 = vector.extract_strided_slice %187 {offsets = [8, 0], sizes = [8, 32], strides = [1, 1]} : vector<16x32xf32> to vector<8x32xf32>
    %219 = vector.extract_strided_slice %188 {offsets = [8, 0], sizes = [8, 32], strides = [1, 1]} : vector<16x32xf32> to vector<8x32xf32>
    %220 = tpu.concatenate %217, %217, %217, %217 in 0 : vector<8x32xf32>, vector<8x32xf32>, vector<8x32xf32>, vector<8x32xf32> -> vector<32x32xf32>
    %221 = arith.mulf %220, %26 : vector<32x32xf32>
    %cst_68 = arith.constant dense<0.000000e+00> : vector<32x8xf32>
    %222 = tpu.matmul %221, %218, %cst_68 {dimension_numbers = #tpu.dot_dimension_numbers<[1], [1], [0], [0], [0, 0, 1, 0], [], []>} : vector<32x32xf32>, vector<8x32xf32>, vector<32x8xf32> -> vector<32x8xf32>
    %223 = vector.extract_strided_slice %27 {offsets = [1, 0], sizes = [1, 8], strides = [1, 1]} : vector<2x8xf32> to vector<1x8xf32>
    %224 = vector.broadcast %223 : vector<1x8xf32> to vector<32x8xf32>
    %225 = arith.addf %222, %224 : vector<32x8xf32>
    %cst_69 = arith.constant dense<0xFF800000> : vector<32xf32>
    %226 = vector.multi_reduction <maximumf>, %225, %cst_69 [1] : vector<32x8xf32> to vector<32xf32>
    %227 = vector.shape_cast %226 : vector<32xf32> to vector<32x1xf32>
    %228 = vector.broadcast %227 : vector<32x1xf32> to vector<32x8xf32>
    %229 = arith.subf %225, %228 : vector<32x8xf32>
    %230 = math.exp %229 : vector<32x8xf32>
    %cst_70 = arith.constant dense<0.000000e+00> : vector<32xf32>
    %231 = vector.multi_reduction <add>, %230, %cst_70 [1] : vector<32x8xf32> to vector<32xf32>
    %232 = vector.shape_cast %231 : vector<32xf32> to vector<32x1xf32>
    %233 = tpu.reciprocal %232 {approx = true} : vector<32x1xf32> -> vector<32x1xf32>
    %234 = vector.broadcast %233 : vector<32x1xf32> to vector<32x8xf32>
    %235 = arith.mulf %230, %234 : vector<32x8xf32>
    %cst_71 = arith.constant dense<0.000000e+00> : vector<32x32xf32>
    %236 = tpu.matmul %235, %219, %cst_71 {dimension_numbers = #tpu.dot_dimension_numbers<[1], [0], [0], [1], [0, 0, 1, 1], [], []>} : vector<32x8xf32>, vector<8x32xf32>, vector<32x32xf32> -> vector<32x32xf32>
    %237 = arith.mulf %236, %26 : vector<32x32xf32>
    %238 = vector.extract_strided_slice %237 {offsets = [0, 0], sizes = [8, 32], strides = [1, 1]} : vector<32x32xf32> to vector<8x32xf32>
    %239 = vector.extract_strided_slice %237 {offsets = [8, 0], sizes = [8, 32], strides = [1, 1]} : vector<32x32xf32> to vector<8x32xf32>
    %240 = arith.addf %238, %239 : vector<8x32xf32>
    %241 = vector.extract_strided_slice %237 {offsets = [16, 0], sizes = [8, 32], strides = [1, 1]} : vector<32x32xf32> to vector<8x32xf32>
    %242 = arith.addf %240, %241 : vector<8x32xf32>
    %243 = vector.extract_strided_slice %237 {offsets = [24, 0], sizes = [8, 32], strides = [1, 1]} : vector<32x32xf32> to vector<8x32xf32>
    %244 = arith.addf %242, %243 : vector<8x32xf32>
    %245 = tpu.concatenate %216, %244 in 0 : vector<8x32xf32>, vector<8x32xf32> -> vector<16x32xf32>
    %c1_72 = arith.constant 1 : index
    %c0_73 = arith.constant 0 : index
    %c0_74 = arith.constant 0 : index
    %246 = vector.load %arg12[%c1_72, %c0_73, %c0_74] : memref<2x6x32xf32, #tpu.memory_space<vmem>>, vector<1x6x32xf32>
    %247 = vector.shape_cast %246 : vector<1x6x32xf32> to vector<6x32xf32>
    %c1_75 = arith.constant 1 : index
    %c0_76 = arith.constant 0 : index
    %c0_77 = arith.constant 0 : index
    %248 = vector.load %arg8[%c1_75, %c0_76, %c0_77] : memref<2x32x32xf32, #tpu.memory_space<vmem>>, vector<1x32x32xf32>
    %249 = vector.shape_cast %248 : vector<1x32x32xf32> to vector<32x32xf32>
    %cst_78 = arith.constant dense<0.000000e+00> : vector<16x32xf32>
    %250 = tpu.matmul %245, %249, %cst_78 {dimension_numbers = #tpu.dot_dimension_numbers<[1], [0], [0], [1], [0, 0, 1, 1], [], []>} : vector<16x32xf32>, vector<32x32xf32>, vector<16x32xf32> -> vector<16x32xf32>
    %251 = vector.extract_strided_slice %247 {offsets = [0, 0], sizes = [1, 32], strides = [1, 1]} : vector<6x32xf32> to vector<1x32xf32>
    %252 = vector.broadcast %251 : vector<1x32xf32> to vector<16x32xf32>
    %253 = arith.addf %250, %252 : vector<16x32xf32>
    %254 = arith.addf %178, %253 : vector<16x32xf32>
    %255 = vector.extract_strided_slice %247 {offsets = [1, 0], sizes = [1, 32], strides = [1, 1]} : vector<6x32xf32> to vector<1x32xf32>
    %256 = vector.extract_strided_slice %247 {offsets = [2, 0], sizes = [1, 32], strides = [1, 1]} : vector<6x32xf32> to vector<1x32xf32>
    %cst_79 = arith.constant dense<0.000000e+00> : vector<16xf32>
    %257 = vector.multi_reduction <add>, %254, %cst_79 [1] : vector<16x32xf32> to vector<16xf32>
    %258 = vector.shape_cast %257 : vector<16xf32> to vector<16x1xf32>
    %cst_80 = arith.constant 3.200000e+01 : f32
    %259 = vector.broadcast %cst_80 : f32 to vector<16x1xf32>
    %260 = arith.divf %258, %259 : vector<16x1xf32>
    %261 = vector.broadcast %260 : vector<16x1xf32> to vector<16x32xf32>
    %262 = arith.subf %254, %261 : vector<16x32xf32>
    %263 = arith.mulf %262, %262 : vector<16x32xf32>
    %cst_81 = arith.constant dense<0.000000e+00> : vector<16xf32>
    %264 = vector.multi_reduction <add>, %263, %cst_81 [1] : vector<16x32xf32> to vector<16xf32>
    %265 = vector.shape_cast %264 : vector<16xf32> to vector<16x1xf32>
    %cst_82 = arith.constant 3.200000e+01 : f32
    %266 = vector.broadcast %cst_82 : f32 to vector<16x1xf32>
    %267 = arith.divf %265, %266 : vector<16x1xf32>
    %268 = vector.broadcast %260 : vector<16x1xf32> to vector<16x32xf32>
    %269 = arith.subf %254, %268 : vector<16x32xf32>
    %cst_83 = arith.constant 9.99999996E-13 : f32
    %270 = vector.broadcast %cst_83 : f32 to vector<16x1xf32>
    %271 = arith.addf %267, %270 : vector<16x1xf32>
    %272 = math.rsqrt %271 : vector<16x1xf32>
    %273 = vector.broadcast %272 : vector<16x1xf32> to vector<16x32xf32>
    %274 = arith.mulf %269, %273 : vector<16x32xf32>
    %275 = vector.broadcast %255 : vector<1x32xf32> to vector<16x32xf32>
    %276 = arith.mulf %274, %275 : vector<16x32xf32>
    %277 = vector.broadcast %256 : vector<1x32xf32> to vector<16x32xf32>
    %278 = arith.addf %276, %277 : vector<16x32xf32>
    %c1_84 = arith.constant 1 : index
    %c0_85 = arith.constant 0 : index
    %c0_86 = arith.constant 0 : index
    %279 = vector.load %arg9[%c1_84, %c0_85, %c0_86] : memref<2x32x64xf32, #tpu.memory_space<vmem>>, vector<1x32x64xf32>
    %280 = vector.shape_cast %279 : vector<1x32x64xf32> to vector<32x64xf32>
    %cst_87 = arith.constant dense<0.000000e+00> : vector<16x64xf32>
    %281 = tpu.matmul %278, %280, %cst_87 {dimension_numbers = #tpu.dot_dimension_numbers<[1], [0], [0], [1], [0, 0, 1, 1], [], []>} : vector<16x32xf32>, vector<32x64xf32>, vector<16x64xf32> -> vector<16x64xf32>
    %c1_88 = arith.constant 1 : index
    %c0_89 = arith.constant 0 : index
    %c0_90 = arith.constant 0 : index
    %282 = vector.load %arg10[%c1_88, %c0_89, %c0_90] : memref<2x1x64xf32, #tpu.memory_space<vmem>>, vector<1x1x64xf32>
    %283 = vector.shape_cast %282 : vector<1x1x64xf32> to vector<1x64xf32>
    %284 = vector.broadcast %283 : vector<1x64xf32> to vector<16x64xf32>
    %285 = arith.addf %281, %284 : vector<16x64xf32>
    %cst_91 = arith.constant 5.000000e-01 : f32
    %286 = vector.broadcast %cst_91 : f32 to vector<16x64xf32>
    %287 = arith.mulf %286, %285 : vector<16x64xf32>
    %cst_92 = arith.constant 4.471500e-02 : f32
    %288 = vector.broadcast %cst_92 : f32 to vector<16x64xf32>
    %289 = arith.mulf %288, %285 : vector<16x64xf32>
    %290 = arith.mulf %289, %285 : vector<16x64xf32>
    %291 = arith.mulf %290, %285 : vector<16x64xf32>
    %292 = arith.addf %285, %291 : vector<16x64xf32>
    %cst_93 = arith.constant 0.797884583 : f32
    %293 = vector.broadcast %cst_93 : f32 to vector<16x64xf32>
    %294 = arith.mulf %293, %292 : vector<16x64xf32>
    %295 = math.tanh %294 : vector<16x64xf32>
    %cst_94 = arith.constant 1.000000e+00 : f32
    %296 = vector.broadcast %cst_94 : f32 to vector<16x64xf32>
    %297 = arith.addf %296, %295 : vector<16x64xf32>
    %298 = arith.mulf %287, %297 : vector<16x64xf32>
    %c1_95 = arith.constant 1 : index
    %c0_96 = arith.constant 0 : index
    %c0_97 = arith.constant 0 : index
    %299 = vector.load %arg11[%c1_95, %c0_96, %c0_97] : memref<2x64x32xf32, #tpu.memory_space<vmem>>, vector<1x64x32xf32>
    %300 = vector.shape_cast %299 : vector<1x64x32xf32> to vector<64x32xf32>
    %cst_98 = arith.constant dense<0.000000e+00> : vector<16x32xf32>
    %301 = tpu.matmul %298, %300, %cst_98 {dimension_numbers = #tpu.dot_dimension_numbers<[1], [0], [0], [1], [0, 0, 1, 1], [], []>} : vector<16x64xf32>, vector<64x32xf32>, vector<16x32xf32> -> vector<16x32xf32>
    %302 = vector.extract_strided_slice %247 {offsets = [3, 0], sizes = [1, 32], strides = [1, 1]} : vector<6x32xf32> to vector<1x32xf32>
    %303 = vector.broadcast %302 : vector<1x32xf32> to vector<16x32xf32>
    %304 = arith.addf %301, %303 : vector<16x32xf32>
    %305 = arith.addf %278, %304 : vector<16x32xf32>
    %306 = vector.extract_strided_slice %247 {offsets = [4, 0], sizes = [1, 32], strides = [1, 1]} : vector<6x32xf32> to vector<1x32xf32>
    %307 = vector.extract_strided_slice %247 {offsets = [5, 0], sizes = [1, 32], strides = [1, 1]} : vector<6x32xf32> to vector<1x32xf32>
    %cst_99 = arith.constant dense<0.000000e+00> : vector<16xf32>
    %308 = vector.multi_reduction <add>, %305, %cst_99 [1] : vector<16x32xf32> to vector<16xf32>
    %309 = vector.shape_cast %308 : vector<16xf32> to vector<16x1xf32>
    %cst_100 = arith.constant 3.200000e+01 : f32
    %310 = vector.broadcast %cst_100 : f32 to vector<16x1xf32>
    %311 = arith.divf %309, %310 : vector<16x1xf32>
    %312 = vector.broadcast %311 : vector<16x1xf32> to vector<16x32xf32>
    %313 = arith.subf %305, %312 : vector<16x32xf32>
    %314 = arith.mulf %313, %313 : vector<16x32xf32>
    %cst_101 = arith.constant dense<0.000000e+00> : vector<16xf32>
    %315 = vector.multi_reduction <add>, %314, %cst_101 [1] : vector<16x32xf32> to vector<16xf32>
    %316 = vector.shape_cast %315 : vector<16xf32> to vector<16x1xf32>
    %cst_102 = arith.constant 3.200000e+01 : f32
    %317 = vector.broadcast %cst_102 : f32 to vector<16x1xf32>
    %318 = arith.divf %316, %317 : vector<16x1xf32>
    %319 = vector.broadcast %311 : vector<16x1xf32> to vector<16x32xf32>
    %320 = arith.subf %305, %319 : vector<16x32xf32>
    %cst_103 = arith.constant 9.99999996E-13 : f32
    %321 = vector.broadcast %cst_103 : f32 to vector<16x1xf32>
    %322 = arith.addf %318, %321 : vector<16x1xf32>
    %323 = math.rsqrt %322 : vector<16x1xf32>
    %324 = vector.broadcast %323 : vector<16x1xf32> to vector<16x32xf32>
    %325 = arith.mulf %320, %324 : vector<16x32xf32>
    %326 = vector.broadcast %306 : vector<1x32xf32> to vector<16x32xf32>
    %327 = arith.mulf %325, %326 : vector<16x32xf32>
    %328 = vector.broadcast %307 : vector<1x32xf32> to vector<16x32xf32>
    %329 = arith.addf %327, %328 : vector<16x32xf32>
    %c0_104 = arith.constant 0 : index
    %c0_105 = arith.constant 0 : index
    %330 = vector.load %arg4[%c0_104, %c0_105] : memref<2x16xf32, #tpu.memory_space<vmem>>, vector<2x16xf32>
    %cst_106 = arith.constant dense<0.000000e+00> : vector<2x32xf32>
    %331 = tpu.matmul %330, %329, %cst_106 {dimension_numbers = #tpu.dot_dimension_numbers<[1], [0], [0], [1], [0, 0, 1, 1], [], []>} : vector<2x16xf32>, vector<16x32xf32>, vector<2x32xf32> -> vector<2x32xf32>
    %c0_107 = arith.constant 0 : index
    %c0_108 = arith.constant 0 : index
    %332 = vector.load %arg13[%c0_107, %c0_108] : memref<32x32xf32, #tpu.memory_space<vmem>>, vector<32x32xf32>
    %cst_109 = arith.constant dense<0.000000e+00> : vector<2x32xf32>
    %333 = tpu.matmul %331, %332, %cst_109 {dimension_numbers = #tpu.dot_dimension_numbers<[1], [0], [0], [1], [0, 0, 1, 1], [], []>} : vector<2x32xf32>, vector<32x32xf32>, vector<2x32xf32> -> vector<2x32xf32>
    %c0_110 = arith.constant 0 : index
    %c0_111 = arith.constant 0 : index
    %334 = vector.load %arg14[%c0_110, %c0_111] : memref<1x32xf32, #tpu.memory_space<vmem>>, vector<1x32xf32>
    %335 = vector.broadcast %334 : vector<1x32xf32> to vector<2x32xf32>
    %336 = arith.addf %333, %335 : vector<2x32xf32>
    %cst_112 = arith.constant 0.000000e+00 : f32
    %337 = vector.broadcast %cst_112 : f32 to vector<2x32xf32>
    %338 = arith.maximumf %336, %337 : vector<2x32xf32>
    %c0_113 = arith.constant 0 : index
    %c0_114 = arith.constant 0 : index
    %339 = vector.load %arg15[%c0_113, %c0_114] : memref<32x8xf32, #tpu.memory_space<vmem>>, vector<32x8xf32>
    %cst_115 = arith.constant dense<0.000000e+00> : vector<2x8xf32>
    %340 = tpu.matmul %338, %339, %cst_115 {dimension_numbers = #tpu.dot_dimension_numbers<[1], [0], [0], [1], [0, 0, 1, 1], [], []>} : vector<2x32xf32>, vector<32x8xf32>, vector<2x8xf32> -> vector<2x8xf32>
    %c0_116 = arith.constant 0 : index
    %c0_117 = arith.constant 0 : index
    %341 = vector.load %arg16[%c0_116, %c0_117] : memref<1x8xf32, #tpu.memory_space<vmem>>, vector<1x8xf32>
    %342 = vector.broadcast %341 : vector<1x8xf32> to vector<2x8xf32>
    %343 = arith.addf %340, %342 : vector<2x8xf32>
    %c0_118 = arith.constant 0 : index
    %c0_119 = arith.constant 0 : index
    %344 = vector.load %arg17[%c0_118, %c0_119] : memref<2x8xf32, #tpu.memory_space<vmem>>, vector<2x8xf32>
    tpu.vector_store %arg17[%c0_118, %c0_119], %343 {strides = array<i32>} : memref<2x8xf32, #tpu.memory_space<vmem>>, vector<2x8xf32>,
    return
  }
  func.func @transform_0(%arg0: i32) -> (i32, i32) {
    %c0_i32 = arith.constant 0 : i32
    %c0_i32_0 = arith.constant 0 : i32
    %c0_i32_1 = arith.constant 0 : i32
    return %c0_i32, %c0_i32_0 : i32, i32
  }
  func.func @transform_1(%arg0: i32) -> (i32, i32) {
    %c0_i32 = arith.constant 0 : i32
    %c0_i32_0 = arith.constant 0 : i32
    %c0_i32_1 = arith.constant 0 : i32
    return %c0_i32, %c0_i32_0 : i32, i32
  }
  func.func @transform_2(%arg0: i32) -> (i32, i32) {
    %c0_i32 = arith.constant 0 : i32
    %c0_i32_0 = arith.constant 0 : i32
    %c0_i32_1 = arith.constant 0 : i32
    return %c0_i32, %c0_i32_0 : i32, i32
  }
  func.func @transform_3(%arg0: i32) -> (i32, i32) {
    %c0_i32 = arith.constant 0 : i32
    %c0_i32_0 = arith.constant 0 : i32
    %c0_i32_1 = arith.constant 0 : i32
    return %c0_i32, %c0_i32_0 : i32, i32
  }
  func.func @transform_4(%arg0: i32) -> (i32, i32) {
    %c0_i32 = arith.constant 0 : i32
    %c0_i32_0 = arith.constant 0 : i32
    %c0_i32_1 = arith.constant 0 : i32
    return %c0_i32, %c0_i32_0 : i32, i32
  }
  func.func @transform_5(%arg0: i32) -> (i32, i32, i32) {
    %c0_i32 = arith.constant 0 : i32
    %c0_i32_0 = arith.constant 0 : i32
    %c0_i32_1 = arith.constant 0 : i32
    %c0_i32_2 = arith.constant 0 : i32
    return %c0_i32, %c0_i32_0, %c0_i32_1 : i32, i32, i32
  }
  func.func @transform_6(%arg0: i32) -> (i32, i32, i32) {
    %c0_i32 = arith.constant 0 : i32
    %c0_i32_0 = arith.constant 0 : i32
    %c0_i32_1 = arith.constant 0 : i32
    %c0_i32_2 = arith.constant 0 : i32
    return %c0_i32, %c0_i32_0, %c0_i32_1 : i32, i32, i32
  }
  func.func @transform_7(%arg0: i32) -> (i32, i32, i32) {
    %c0_i32 = arith.constant 0 : i32
    %c0_i32_0 = arith.constant 0 : i32
    %c0_i32_1 = arith.constant 0 : i32
    %c0_i32_2 = arith.constant 0 : i32
    return %c0_i32, %c0_i32_0, %c0_i32_1 : i32, i32, i32
  }
  func.func @transform_8(%arg0: i32) -> (i32, i32, i32) {
    %c0_i32 = arith.constant 0 : i32
    %c0_i32_0 = arith.constant 0 : i32
    %c0_i32_1 = arith.constant 0 : i32
    %c0_i32_2 = arith.constant 0 : i32
    return %c0_i32, %c0_i32_0, %c0_i32_1 : i32, i32, i32
  }
  func.func @transform_9(%arg0: i32) -> (i32, i32, i32) {
    %c0_i32 = arith.constant 0 : i32
    %c0_i32_0 = arith.constant 0 : i32
    %c0_i32_1 = arith.constant 0 : i32
    %c0_i32_2 = arith.constant 0 : i32
    return %c0_i32, %c0_i32_0, %c0_i32_1 : i32, i32, i32
  }
  func.func @transform_10(%arg0: i32) -> (i32, i32, i32) {
    %c0_i32 = arith.constant 0 : i32
    %c0_i32_0 = arith.constant 0 : i32
    %c0_i32_1 = arith.constant 0 : i32
    %c0_i32_2 = arith.constant 0 : i32
    return %c0_i32, %c0_i32_0, %c0_i32_1 : i32, i32, i32
  }
  func.func @transform_11(%arg0: i32) -> (i32, i32, i32) {
    %c0_i32 = arith.constant 0 : i32
    %c0_i32_0 = arith.constant 0 : i32
    %c0_i32_1 = arith.constant 0 : i32
    %c0_i32_2 = arith.constant 0 : i32
    return %c0_i32, %c0_i32_0, %c0_i32_1 : i32, i32, i32
  }
  func.func @transform_12(%arg0: i32) -> (i32, i32) {
    %c0_i32 = arith.constant 0 : i32
    %c0_i32_0 = arith.constant 0 : i32
    %c0_i32_1 = arith.constant 0 : i32
    return %c0_i32, %c0_i32_0 : i32, i32
  }
  func.func @transform_13(%arg0: i32) -> (i32, i32) {
    %c0_i32 = arith.constant 0 : i32
    %c0_i32_0 = arith.constant 0 : i32
    %c0_i32_1 = arith.constant 0 : i32
    return %c0_i32, %c0_i32_0 : i32, i32
  }
  func.func @transform_14(%arg0: i32) -> (i32, i32) {
    %c0_i32 = arith.constant 0 : i32
    %c0_i32_0 = arith.constant 0 : i32
    %c0_i32_1 = arith.constant 0 : i32
    return %c0_i32, %c0_i32_0 : i32, i32
  }
  func.func @transform_15(%arg0: i32) -> (i32, i32) {
    %c0_i32 = arith.constant 0 : i32
    %c0_i32_0 = arith.constant 0 : i32
    %c0_i32_1 = arith.constant 0 : i32
    return %c0_i32, %c0_i32_0 : i32, i32
  }
  func.func @transform_16(%arg0: i32) -> (i32, i32) {
    %c0_i32 = arith.constant 0 : i32
    %c0_i32_0 = arith.constant 0 : i32
    %c0_i32_1 = arith.constant 0 : i32
    return %c0_i32, %c0_i32_0 : i32, i32
  }
}

</mosaic_0001>

<bundles_post_ra>
// kernel: forward.1
= control target key start
LH: loop header
LB: loop body
LE: loop exit
PB: predicated region body
PF: predicated region fallthrough
CT: control target
= control target key end

     0   :  { %s3531_s0 = inlined_call_operand.vmem [shape: f32[16,32], index: 0, kind: input, shape index: {}]   ;;  %s3532_s1 = inlined_call_operand.vmem [shape: f32[2,8], index: 1, kind: input, shape index: {}]   ;;  %s3533_s2 = inlined_call_operand.vmem [shape: f32[32,32], index: 2, kind: input, shape index: {}]   ;;  %s3534_s3 = inlined_call_operand.vmem [shape: f32[2,16], index: 3, kind: input, shape index: {}]   ;;  %s3535_s4 = inlined_call_operand.vmem [shape: f32[2,32], index: 4, kind: input, shape index: {}]   ;;  %s3536_s5 = inlined_call_operand.vmem [shape: f32[2,32,96], index: 5, kind: input, shape index: {}]   ;;  %s3537_s6 = inlined_call_operand.vmem [shape: f32[2,1,96], index: 6, kind: input, shape index: {}]   ;;  %s3538_s7 = inlined_call_operand.vmem [shape: f32[2,32,32], index: 7, kind: input, shape index: {}]   ;;  %s3539_s8 = inlined_call_operand.vmem [shape: f32[2,32,64], index: 8, kind: input, shape index: {}]   ;;  %s3540_s9 = inlined_call_operand.vmem [shape: f32[2,1,64], index: 9, kind: input, shape index: {}]   ;;  %s3541_s10 = inlined_call_operand.vmem [shape: f32[2,64,32], index: 10, kind: input, shape index: {}]   ;;  %s3542_s11 = inlined_call_operand.vmem [shape: f32[2,6,32], index: 11, kind: input, shape index: {}]   ;;  %s3543_s12 = inlined_call_operand.vmem [shape: f32[32,32], index: 12, kind: input, shape index: {}]   ;;  %s3544_s13 = inlined_call_operand.vmem [shape: f32[1,32], index: 13, kind: input, shape index: {}]   ;;  %s3545_s14 = inlined_call_operand.vmem [shape: f32[32,8], index: 14, kind: input, shape index: {}]   ;;  %s3546_s15 = inlined_call_operand.vmem [shape: f32[1,8], index: 15, kind: input, shape index: {}]   ;;  %s3547_s16 = inlined_call_operand.hbm [shape: f32[2,8], index: 16, kind: output, shape index: {}]  }
   0x1   :  { %3549 = sst [smem:[#allocation5_spill]] %s3531_s0 }
   0x2   :  { %s3550_s23 = sld [smem:[#allocation5_spill]]  ;;  %vm57_vm0 = vcmask 261120  }
   0x8   :  { %v55_v0 = vld [vmem:[%s3550_s23] sm:$0xff]  ;;  %v56_v1 = vld [vmem:[%s3550_s23 + $0x8] sm:$0xff] }
   0x9   :  { %21 = vsyncpa [#allocation3], 0  ;;  %v58_v2 = vsel %vm57_vm0, %v55_v0, 0.0  ;;  %v61_v3 = vsel %vm57_vm0, %v56_v1, 0.0  ;;  %v102_v14 = vld [vmem:[%s3536_s5] sm:$0xff]  ;;  %v103_v15 = vld [vmem:[%s3536_s5 + $0x8] sm:$0xff]  ;;  %v85_v22 = vlaneseq }
   0xa   :  { %59 = vadd.xlane.f32.xlu0 %v58_v2  ;;  %v104_v16 = vld [vmem:[%s3536_s5 + $0x10] sm:$0xff]  ;;  %v2727_v17 = vpack.c.bf16 %v103_v15, %v102_v14  ;;  %v105_v18 = vld [vmem:[%s3536_s5 + $0x18] sm:$0xff]  ;;  %v54_v29 = vld [vmem:[%s3535_s4] sm:$0x3]  ;;  %s2948_s24 = smov 96   ;;  %vm304_vm1 = vcmask 64512  }
   0xb   :  { %v2731_v19 = vpack.c.bf16 %v105_v18, %v104_v16  ;;  %v3061_v26 = vshrl.u32 %v85_v22, 7  ;;  %v2337_v41 = vld [vmem:[%s3537_s6] ss:$0 sm:$0xff]  ;;  %v3104_v49 = vld [vmem:[%s3533_s2 + $0x8] sm:$0xff]  ;;  %v3110_v50 = vld [vmem:[%s3533_s2 + $0x10] sm:$0xff]  ;;  %vm969_vm2 = vcmask 523264  }
   0xc   :  { %2728 = vmatprep.subr.bf16.mxu0 %v2727_v17  ;;  %v3090_v45 = vld [vmem:[%s3533_s2] sm:$0xff]  ;;  %v3121_v54 = vld [vmem:[%s3533_s2 + $0x18] sm:$0xff]  ;;  %vm2951_vm3 = vmmov 0   ;;  %vm2078_vm4 = vcmask 130048   ;;  %s2953_s30 = smov [#allocation2]   ;;  %vm2321_vm5 = vcmask 58368  }
   0xd   :  { %2730 = vmatpush3.bf16.msra.mxu0 %v2727_v17  ;;  %v3064_v28 = vsub.s32 0, %v3061_v26  ;;  %v3070_v30 = vsub.s32 1, %v3061_v26  ;;  %v101_v60 = vld [vmem:[%s3532_s1] sm:$0x3]  ;;  %s2949_s1 = smov 64  }
   0xe   :  { %62 = vadd.xlane.f32.xlu0 %v61_v3  ;;  %2732 = vmatprep.subr.bf16.mxu0 %v2731_v19 }
   0xf   :  { %v88_v31 = vrot.slane %v54_v29, %v3064_v28  ;;  %v94_v34 = vrot.slane %v54_v29, %v3070_v30  ;;  %v3145_v61 = vrot.slane %v101_v60, %v3064_v28 }
  0x11   :  { %2734 = vmatpush3.bf16.msra.mxu0 %v2731_v19 }
  0x97   :  { %v60_v4 = vpop.xlane.xlu0 %59 }
  0x98   :  { %v65_v5 = vmul.f32 0.03125, %v60_v4 }
  0x9a   :  { %v67_v6 = vsub.f32 %v55_v0, %v65_v5  ;;  %v3152_v5 = vrot.slane %v101_v60, %v3070_v30 }
  0x9b   :  { %v63_v7 = vpop.xlane.xlu0 %62 }
  0x9c   :  { %v66_v8 = vmul.f32 0.03125, %v63_v7  ;;  %v69_v9 = vmul.f32 %v67_v6, %v67_v6 }
  0x9e   :  { %v68_v10 = vsub.f32 %v56_v1, %v66_v8  ;;  %v71_v11 = vsel %vm57_vm0, %v69_v9, 0.0 }
  0x9f   :  { %72 = vadd.xlane.f32.xlu1 %v71_v11 }
  0xa0   :  { %v70_v12 = vmul.f32 %v68_v10, %v68_v10 }
  0xa2   :  { %v74_v13 = vsel %vm57_vm0, %v70_v12, 0.0 }
  0xa3   :  { %75 = vadd.xlane.f32.xlu1 %v74_v13 }
 0x12c   :  { %v73_v20 = vpop.xlane.xlu1 %72 }
 0x12d   :  { %v77_v21 = vmul.f32 0.03125, %v73_v20 }
 0x12f   :  { %v79_v23 = vadd.f32 1e-12, %v77_v21 }
 0x130   :  { %v76_v24 = vpop.xlane.xlu1 %75 }
 0x131   :  { %2828 = vrsqrt.f32 %v79_v23  ;;  %v78_v25 = vmul.f32 0.03125, %v76_v24 }
 0x133   :  { %v80_v27 = vadd.f32 1e-12, %v78_v25 }
 0x135   :  { %2830 = vrsqrt.f32 %v80_v27 }
 0x13b   :  { %v2829_v32 = vpop.eup %2828 }
 0x13c   :  { %v83_v33 = vmul.f32 %v2829_v32, %v67_v6 }
 0x13e   :  { %v89_v35 = vmul.f32 %v88_v31, %v83_v33 }
 0x13f   :  { %v2831_v36 = vpop.eup %2830 }
 0x140   :  { %v84_v37 = vmul.f32 %v2831_v36, %v68_v10  ;;  %v3074_v38 = vadd.f32 %v94_v34, %v89_v35 }
 0x142   :  { %v90_v39 = vmul.f32 %v88_v31, %v84_v37  ;;  %2538 = vmatprep.mubr.msk.f32.mxu0 %vm57_vm0, %v3074_v38 }
 0x144   :  { %v3078_v40 = vadd.f32 %v94_v34, %v90_v39 }
 0x146   :  { %2539 = vmatmul.mubr.msk.f32.vlgmr.msra.gmra.mrb[0].mxu0 %vm57_vm0, %v3078_v40 }
 0x219   :  { %v2540_v42 = vpop.f32.mrb[0].mxu0 }
 0x21a   :  { %v3085_v43 = vadd.f32 %v2540_v42, %v2337_v41  ;;  %v185_v44 = vpop.f32.mrb[1].mxu0 }
 0x21b   :  { %v3092_v46 = vadd.f32 %v2337_v41, %v185_v44 }
 0x21c   :  { %465 = vrot.lane.b32.xlu1 %v3085_v43, %s2948_s24  ;;  %v456_v56 = vmul.f32 %v3085_v43, %v3090_v45  ;;  %v457_v57 = vmul.f32 %v3085_v43, %v3104_v49  ;;  %v458_v58 = vmul.f32 %v3085_v43, %v3110_v50  ;;  %v459_v59 = vmul.f32 %v3085_v43, %v3121_v54 }
 0x21d   :  { %203 = vrot.lane.b32.xlu0 %v3092_v46, %s2948_s24  ;;  %v194_v47 = vmul.f32 %v3092_v46, %v3090_v45  ;;  %v195_v52 = vmul.f32 %v3092_v46, %v3104_v49  ;;  %v196_v53 = vmul.f32 %v3092_v46, %v3110_v50  ;;  %v197_v55 = vmul.f32 %v3092_v46, %v3121_v54 }
 0x21f   :  { %2543 = vmatprep.mubr.msk.f32.mxu1 %vm57_vm0, %v194_v47 }
 0x28e   :  { %v466_v51 = vpop.permute.xlu1 %465 }
 0x28f   :  { %v204_v48 = vpop.permute.xlu0 %203 }
 0x290   :  { %2541 = vmatprep.subr.msk.mxu1 %vm57_vm0, %v204_v48 }
 0x291   :  { %2542 = vmatpush3.xpose.msk.msra.mxu1 %vm57_vm0, %v204_v48 }
 0x292   :  { %2557 = vmatprep.subr.msk.mxu1 %vm57_vm0, %v466_v51 }
 0x294   :  { %2544 = vmatmul.mubr.msk.f32.vlgmr.msra.gmra.mrb[0].mxu1 %vm57_vm0, %v195_v52 }
 0x295   :  { %2546 = vmatprep.mubr.msk.f32.mxu1 %vm57_vm0, %v196_v53  ;;  %2558 = vmatpush3.xpose.msk.msra.mxu1 %vm57_vm0, %v466_v51 }
 0x298   :  { %2547 = vmatmul.mubr.msk.f32.gmra.mrb[2].mxu1 %vm57_vm0, %v197_v55 }
 0x299   :  { %2559 = vmatprep.mubr.msk.f32.mxu1 %vm57_vm0, %v456_v56 }
 0x29c   :  { %2560 = vmatmul.mubr.msk.f32.vlgmr.msra.gmra.mrb[4].mxu1 %vm57_vm0, %v457_v57 }
 0x29d   :  { %2562 = vmatprep.mubr.msk.f32.mxu1 %vm57_vm0, %v458_v58 }
 0x2a0   :  { %2563 = vmatmul.mubr.msk.f32.gmra.mrb[6].mxu1 %vm57_vm0, %v459_v59 }
 0x367   :  { %v2545_v62 = vpop.f32.mrb[0].mxu1 }
 0x368   :  { %v291_v63 = vadd.f32 %v2545_v62, %v3145_v61  ;;  %v285_v0 = vpop.f32.mrb[1].mxu1 }
 0x369   :  { %v286_v1 = vadd.f32 %v285_v0, %v3145_v61 }
 0x36a   :  { %v308_v2 = vsel %vm304_vm1, %v291_v63, -inf }
 0x36b   :  { %309 = vmax.xlane.f32.xlu0 %v308_v2  ;;  %v2548_v3 = vpop.f32.mrb[2].mxu1  ;;  %v305_v4 = vsel %vm304_vm1, %v286_v1, -inf }
 0x36c   :  { %v301_v6 = vadd.f32 %v2548_v3, %v3145_v61  ;;  %v295_v7 = vpop.f32.mrb[3].mxu1  ;;  %306 = vmax.xlane.f32.xlu1 %v305_v4 }
 0x36d   :  { %v296_v8 = vadd.f32 %v295_v7, %v3145_v61 }
 0x36e   :  { %v314_v9 = vsel %vm304_vm1, %v301_v6, -inf }
 0x36f   :  { %v2561_v10 = vpop.f32.mrb[4].mxu1  ;;  %v311_v11 = vsel %vm304_vm1, %v296_v8, -inf }
 0x370   :  { %v553_v12 = vadd.f32 %v2561_v10, %v3152_v5  ;;  %v547_v13 = vpop.f32.mrb[5].mxu1  ;;  %312 = vmax.xlane.f32.xlu0 %v311_v11  ;;  %315 = vmax.xlane.f32.xlu1 %v314_v9 }
 0x371   :  { %v548_v14 = vadd.f32 %v547_v13, %v3152_v5 }
 0x372   :  { %v569_v15 = vsel %vm304_vm1, %v553_v12, -inf }
 0x373   :  { %v2564_v16 = vpop.f32.mrb[6].mxu1  ;;  %v566_v17 = vsel %vm304_vm1, %v548_v14, -inf }
 0x374   :  { %v563_v18 = vadd.f32 %v2564_v16, %v3152_v5  ;;  %v557_v19 = vpop.f32.mrb[7].mxu1  ;;  %567 = vmax.xlane.f32.xlu0 %v566_v17  ;;  %570 = vmax.xlane.f32.xlu1 %v569_v15 }
 0x375   :  { %v558_v20 = vadd.f32 %v557_v19, %v3152_v5 }
 0x376   :  { %v575_v21 = vsel %vm304_vm1, %v563_v18, -inf }
 0x377   :  { %v572_v22 = vsel %vm304_vm1, %v558_v20, -inf }
 0x378   :  { %573 = vmax.xlane.f32.xlu0 %v572_v22  ;;  %576 = vmax.xlane.f32.xlu1 %v575_v21 }
 0x3f8   :  { %v310_v23 = vpop.xlane.xlu0 %309 }
 0x3f9   :  { %v318_v24 = vsub.f32 %v291_v63, %v310_v23  ;;  %v307_v25 = vpop.xlane.xlu1 %306 }
 0x3fa   :  { %v317_v27 = vsub.f32 %v286_v1, %v307_v25 }
 0x3fb   :  { %v323_v29 = vmul.f32 1.442695, %v318_v24 }
 0x3fc   :  { %v321_v31 = vmul.f32 1.442695, %v317_v27 }
 0x3fd   :  { %2832 = vpow2.f32 %v323_v29  ;;  %v313_v32 = vpop.xlane.xlu0 %312  ;;  %v316_v33 = vpop.xlane.xlu1 %315 }
 0x3fe   :  { %2834 = vpow2.f32 %v321_v31  ;;  %v319_v34 = vsub.f32 %v296_v8, %v313_v32  ;;  %v320_v35 = vsub.f32 %v301_v6, %v316_v33 }
 0x400   :  { %v325_v36 = vmul.f32 1.442695, %v319_v34  ;;  %v327_v37 = vmul.f32 1.442695, %v320_v35 }
 0x401   :  { %v568_v39 = vpop.xlane.xlu0 %567  ;;  %v571_v41 = vpop.xlane.xlu1 %570 }
 0x402   :  { %2836 = vpow2.f32 %v325_v36  ;;  %v578_v42 = vsub.f32 %v548_v14, %v568_v39  ;;  %v579_v44 = vsub.f32 %v553_v12, %v571_v41  ;;  %v718_v41 = vld [vmem:[%s3538_s7] sm:$0xff] }
 0x403   :  { %2838 = vpow2.f32 %v327_v37 }
 0x404   :  { %v582_v47 = vmul.f32 1.442695, %v578_v42  ;;  %v584_v48 = vmul.f32 1.442695, %v579_v44  ;;  %v719_v42 = vld [vmem:[%s3538_s7 + $0x8] sm:$0xff] }
 0x405   :  { %v574_v51 = vpop.xlane.xlu0 %573  ;;  %v577_v52 = vpop.xlane.xlu1 %576  ;;  %v2735_v44 = vpack.c.bf16 %v719_v42, %v718_v41 }
 0x406   :  { %2840 = vpow2.f32 %v582_v47  ;;  %v580_v53 = vsub.f32 %v558_v20, %v574_v51  ;;  %v581_v55 = vsub.f32 %v563_v18, %v577_v52  ;;  %v720_v47 = vld [vmem:[%s3538_s7 + $0x10] sm:$0xff] }
 0x407   :  { %v2833_v56 = vpop.eup %2832  ;;  %2842 = vpow2.f32 %v584_v48  ;;  %2736 = vmatprep.subr.bf16.mxu1 %v2735_v44  ;;  %v721_v48 = vld [vmem:[%s3538_s7 + $0x18] sm:$0xff] }
 0x408   :  { %v2835_v57 = vpop.eup %2834  ;;  %v586_v58 = vmul.f32 1.442695, %v580_v53  ;;  %v588_v59 = vmul.f32 1.442695, %v581_v55  ;;  %v332_v60 = vsel %vm304_vm1, %v2833_v56, 0.0  ;;  %2738 = vmatpush3.bf16.msra.mxu1 %v2735_v44  ;;  %v2739_v51 = vpack.c.bf16 %v721_v48, %v720_v47 }
 0x409   :  { %333 = vadd.xlane.f32.xlu1 %v332_v60  ;;  %v329_v62 = vsel %vm304_vm1, %v2835_v57, 0.0 }
 0x40a   :  { %2844 = vpow2.f32 %v586_v58  ;;  %330 = vadd.xlane.f32.xlu0 %v329_v62  ;;  %2740 = vmatprep.subr.bf16.mxu1 %v2739_v51 }
 0x40b   :  { %2846 = vpow2.f32 %v588_v59 }
 0x40c   :  { %v2837_v63 = vpop.eup %2836  ;;  %2742 = vmatpush3.bf16.msra.mxu1 %v2739_v51  ;;  %v843_v51 = vsub.s32 2, %v3061_v26 }
 0x40d   :  { %v2839_v0 = vpop.eup %2838  ;;  %v335_v1 = vsel %vm304_vm1, %v2837_v63, 0.0 }
 0x40e   :  { %336 = vadd.xlane.f32.xlu0 %v335_v1  ;;  %v338_v2 = vsel %vm304_vm1, %v2839_v0, 0.0 }
 0x40f   :  { %339 = vadd.xlane.f32.xlu1 %v338_v2 }
 0x410   :  { %v2841_v3 = vpop.eup %2840 }
 0x411   :  { %v2843_v4 = vpop.eup %2842  ;;  %v590_v6 = vsel %vm304_vm1, %v2841_v3, 0.0 }
 0x412   :  { %591 = vadd.xlane.f32.xlu0 %v590_v6  ;;  %v593_v7 = vsel %vm304_vm1, %v2843_v4, 0.0 }
 0x413   :  { %594 = vadd.xlane.f32.xlu1 %v593_v7 }
 0x414   :  { %v2845_v8 = vpop.eup %2844 }
 0x415   :  { %v2847_v9 = vpop.eup %2846  ;;  %v596_v10 = vsel %vm304_vm1, %v2845_v8, 0.0 }
 0x416   :  { %597 = vadd.xlane.f32.xlu0 %v596_v10  ;;  %v599_v11 = vsel %vm304_vm1, %v2847_v9, 0.0 }
 0x417   :  { %600 = vadd.xlane.f32.xlu1 %v599_v11 }
 0x428   :  { %610 = vrot.lane.b32.xlu1 %v3085_v43, %s2949_s1 }
 0x42c   :  { %349 = vrot.lane.b32.xlu0 %v3092_v46, %s2949_s1 }
 0x496   :  { %v334_v12 = vpop.xlane.xlu1 %333 }
 0x497   :  { %v331_v13 = vpop.xlane.xlu0 %330 }
 0x498   :  { %2848 = vrcp.f32 %v331_v13  ;;  %v3211_v13 = vld [vmem:[%s3542_s11] sm:$0x3f] }
 0x499   :  { %2850 = vrcp.f32 %v334_v12 }
 0x49b   :  { %v337_v14 = vpop.xlane.xlu0 %336 }
 0x49c   :  { %2852 = vrcp.f32 %v337_v14  ;;  %v340_v15 = vpop.xlane.xlu1 %339  ;;  %v725_v14 = vrot.slane %v3211_v13, %v3064_v28 }
 0x49d   :  { %2854 = vrcp.f32 %v340_v15 }
 0x49f   :  { %v592_v16 = vpop.xlane.xlu0 %591 }
 0x4a0   :  { %2856 = vrcp.f32 %v592_v16  ;;  %v595_v17 = vpop.xlane.xlu1 %594 }
 0x4a1   :  { %2858 = vrcp.f32 %v595_v17 }
 0x4a2   :  { %v2849_v18 = vpop.eup %2848 }
 0x4a3   :  { %v598_v19 = vpop.xlane.xlu0 %597  ;;  %v345_v20 = vmul.f32 %v2849_v18, %v2835_v57  ;;  %v2851_v21 = vpop.eup %2850 }
 0x4a4   :  { %2860 = vrcp.f32 %v598_v19  ;;  %v601_v43 = vpop.xlane.xlu1 %600  ;;  %v346_v23 = vmul.f32 %v2851_v21, %v2833_v56 }
 0x4a5   :  { %2551 = vmatprep.mubr.msk.f32.mxu0 %vm304_vm1, %v345_v20  ;;  %2862 = vrcp.f32 %v601_v43 }
 0x4a6   :  { %v2853_v46 = vpop.eup %2852 }
 0x4a7   :  { %v350_v22 = vpop.permute.xlu0 %349  ;;  %v2855_v24 = vpop.eup %2854  ;;  %v347_v27 = vmul.f32 %v2853_v46, %v2837_v63 }
 0x4a8   :  { %2549 = vmatprep.subr.mxu0 %v350_v22  ;;  %v611_v25 = vpop.permute.xlu1 %610  ;;  %v348_v31 = vmul.f32 %v2855_v24, %v2839_v0 }
 0x4a9   :  { %2550 = vmatpush3.msra.mxu0 %v350_v22 }
 0x4aa   :  { %v2857_v29 = vpop.eup %2856  ;;  %2552 = vmatmul.mubr.msk.f32.vlgmr.msra.gmra.mrb[2].mxu0 %vm304_vm1, %v346_v23  ;;  %2565 = vmatprep.subr.mxu0 %v611_v25 }
 0x4ab   :  { %2554 = vmatprep.mubr.msk.f32.mxu0 %vm304_vm1, %v347_v27  ;;  %2566 = vmatpush3.msra.mxu0 %v611_v25  ;;  %v2859_v32 = vpop.eup %2858  ;;  %v606_v33 = vmul.f32 %v2857_v29, %v2841_v3 }
 0x4ac   :  { %v607_v35 = vmul.f32 %v2859_v32, %v2843_v4 }
 0x4ae   :  { %v2861_v34 = vpop.eup %2860  ;;  %2555 = vmatmul.mubr.msk.f32.gmra.mrb[4].mxu0 %vm304_vm1, %v348_v31 }
 0x4af   :  { %2567 = vmatprep.mubr.msk.f32.mxu0 %vm304_vm1, %v606_v33  ;;  %v2863_v36 = vpop.eup %2862  ;;  %v608_v37 = vmul.f32 %v2861_v34, %v2845_v8  ;;  %v848_v33 = vld [vmem:[%s3539_s8 + $0x8] sm:$0xff] }
 0x4b0   :  { %v609_v39 = vmul.f32 %v2863_v36, %v2847_v9  ;;  %v850_v36 = vld [vmem:[%s3539_s8 + $0x18] sm:$0xff] }
 0x4b2   :  { %2568 = vmatmul.mubr.msk.f32.vlgmr.msra.gmra.mrb[6].mxu0 %vm304_vm1, %v607_v35  ;;  %v849_v35 = vld [vmem:[%s3539_s8 + $0x10] sm:$0xff] }
 0x4b3   :  { %2570 = vmatprep.mubr.msk.f32.mxu0 %vm304_vm1, %v608_v37  ;;  %v2747_v37 = vpack.c.bf16 %v850_v36, %v849_v35  ;;  %v967_v36 = vsub.s32 3, %v3061_v26 }
 0x4b6   :  { %2571 = vmatmul.mubr.msk.f32.gmra.mrb[8].mxu0 %vm304_vm1, %v609_v39 }
 0x57d   :  { %v2553_v52 = vpop.f32.mrb[2].mxu0 }
 0x57e   :  { %v450_v53 = vmul.f32 %v2553_v52, %v3104_v49  ;;  %v430_v55 = vpop.f32.mrb[3].mxu0  ;;  %v838_v52 = vrot.slane %v3211_v13, %v3070_v30 }
 0x57f   :  { %v449_v56 = vmul.f32 %v430_v55, %v3090_v45 }
 0x581   :  { %v453_v57 = vadd.f32 %v450_v53, %v449_v56  ;;  %v2556_v58 = vpop.f32.mrb[4].mxu0 }
 0x582   :  { %v440_v59 = vpop.f32.mrb[5].mxu0  ;;  %v452_v62 = vmul.f32 %v2556_v58, %v3121_v54  ;;  %v844_v58 = vrot.slane %v3211_v13, %v843_v51 }
 0x583   :  { %v451_v60 = vmul.f32 %v440_v59, %v3110_v50 }
 0x585   :  { %v454_v63 = vadd.f32 %v453_v57, %v451_v60  ;;  %v2569_v0 = vpop.f32.mrb[6].mxu0 }
 0x586   :  { %v711_v1 = vmul.f32 %v2569_v0, %v3104_v49  ;;  %v691_v2 = vpop.f32.mrb[7].mxu0  ;;  %v957_v0 = vld [vmem:[%s3541_s10] sm:$0xff] }
 0x587   :  { %v455_v3 = vadd.f32 %v454_v63, %v452_v62  ;;  %v710_v4 = vmul.f32 %v691_v2, %v3090_v45 }
 0x589   :  { %v714_v6 = vadd.f32 %v711_v1, %v710_v4  ;;  %v2572_v7 = vpop.f32.mrb[8].mxu0  ;;  %2581 = vmatprep.mubr.msk.f32.mxu1 %vm57_vm0, %v455_v3  ;;  %v958_v1 = vld [vmem:[%s3541_s10 + $0x8] sm:$0xff]  ;;  %v959_v3 = vld [vmem:[%s3541_s10 + $0x10] sm:$0xff]  ;;  %v960_v4 = vld [vmem:[%s3541_s10 + $0x18] sm:$0xff] }
 0x58a   :  { %v701_v8 = vpop.f32.mrb[9].mxu0  ;;  %v713_v10 = vmul.f32 %v2572_v7, %v3121_v54  ;;  %v2751_v2 = vpack.c.bf16 %v958_v1, %v957_v0  ;;  %v961_v7 = vld [vmem:[%s3541_s10 + $0x20] sm:$0xff] }
 0x58b   :  { %v712_v9 = vmul.f32 %v701_v8, %v3110_v50  ;;  %v962_v8 = vld [vmem:[%s3541_s10 + $0x28] sm:$0xff] }
 0x58c   :  { %2752 = vmatprep.subr.bf16.mxu1 %v2751_v2 }
 0x58d   :  { %v715_v11 = vadd.f32 %v714_v6, %v712_v9  ;;  %v2755_v6 = vpack.c.bf16 %v960_v4, %v959_v3  ;;  %v2759_v9 = vpack.c.bf16 %v962_v8, %v961_v7  ;;  %v2366_v3 = vld [vmem:[%s3536_s5 + $0x28] sm:$0xff]  ;;  %v2368_v7 = vld [vmem:[%s3536_s5 + $0x38] sm:$0xff] }
 0x58f   :  { %v716_v12 = vadd.f32 %v715_v11, %v713_v10  ;;  %v963_v10 = vld [vmem:[%s3541_s10 + $0x30] sm:$0xff]  ;;  %v964_v11 = vld [vmem:[%s3541_s10 + $0x38] sm:$0xff] }
 0x591   :  { %2582 = vmatmul.mubr.msk.f32.vlgmr.msra.gmra.mrb[8].mxu1 %vm57_vm0, %v716_v12  ;;  %v2763_v12 = vpack.c.bf16 %v964_v11, %v963_v10 }
 0x592   :  { %2754 = vmatpush3.bf16.msra.mxu1 %v2751_v2 }
 0x593   :  { %2756 = vmatprep.subr.bf16.mxu1 %v2755_v6 }
 0x596   :  { %2758 = vmatpush3.bf16.msra.mxu1 %v2755_v6  ;;  %v2367_v6 = vld [vmem:[%s3536_s5 + $0x30] sm:$0xff] }
 0x597   :  { %2760 = vmatprep.subr.bf16.mxu1 %v2759_v9  ;;  %v2771_v8 = vpack.c.bf16 %v2368_v7, %v2367_v6 }
 0x59a   :  { %2762 = vmatpush3.bf16.msra.mxu1 %v2759_v9 }
 0x59b   :  { %2764 = vmatprep.subr.bf16.mxu1 %v2763_v12 }
 0x59e   :  { %2766 = vmatpush3.bf16.msra.mxu1 %v2763_v12 }
 0x664   :  { %v2583_v15 = vpop.f32.mrb[8].mxu1 }
 0x665   :  { %v804_v16 = vadd.f32 %v2583_v15, %v725_v14  ;;  %v798_v17 = vpop.f32.mrb[9].mxu1 }
 0x666   :  { %v799_v18 = vadd.f32 %v798_v17, %v725_v14  ;;  %v2360_v14 = vld [vmem:[%s3540_s9] ss:$0 sm:$0xff] }
 0x667   :  { %v808_v19 = vadd.f32 %v804_v16, %v3078_v40 }
 0x668   :  { %v807_v20 = vadd.f32 %v799_v18, %v3074_v38  ;;  %v847_v38 = vld [vmem:[%s3539_s8] sm:$0xff] }
 0x669   :  { %v812_v43 = vsel %vm57_vm0, %v808_v19, 0.0  ;;  %v2743_v34 = vpack.c.bf16 %v848_v33, %v847_v38 }
 0x66a   :  { %813 = vadd.xlane.f32.xlu0 %v812_v43  ;;  %v809_v21 = vsel %vm57_vm0, %v807_v20, 0.0 }
 0x66b   :  { %810 = vadd.xlane.f32.xlu1 %v809_v21  ;;  %2744 = vmatprep.subr.bf16.mxu0 %v2743_v34 }
 0x66c   :  { %2746 = vmatpush3.bf16.msra.mxu0 %v2743_v34 }
 0x66d   :  { %2748 = vmatprep.subr.bf16.mxu0 %v2747_v37 }
 0x670   :  { %2750 = vmatpush3.bf16.msra.mxu0 %v2747_v37  ;;  %v968_v37 = vrot.slane %v3211_v13, %v967_v36 }
 0x6f7   :  { %v814_v46 = vpop.xlane.xlu0 %813 }
 0x6f8   :  { %v816_v22 = vmul.f32 0.03125, %v814_v46  ;;  %v811_v23 = vpop.xlane.xlu1 %810 }
 0x6f9   :  { %v815_v24 = vmul.f32 0.03125, %v811_v23 }
 0x6fa   :  { %v818_v25 = vsub.f32 %v808_v19, %v816_v22 }
 0x6fb   :  { %v817_v27 = vsub.f32 %v807_v20, %v815_v24 }
 0x6fc   :  { %v820_v29 = vmul.f32 %v818_v25, %v818_v25 }
 0x6fd   :  { %v819_v31 = vmul.f32 %v817_v27, %v817_v27 }
 0x6fe   :  { %v824_v32 = vsel %vm57_vm0, %v820_v29, 0.0 }
 0x6ff   :  { %825 = vadd.xlane.f32.xlu1 %v824_v32  ;;  %v821_v40 = vsel %vm57_vm0, %v819_v31, 0.0 }
 0x700   :  { %822 = vadd.xlane.f32.xlu0 %v821_v40 }
 0x78c   :  { %v826_v39 = vpop.xlane.xlu1 %825 }
 0x78d   :  { %v828_v41 = vmul.f32 0.03125, %v826_v39  ;;  %v823_v42 = vpop.xlane.xlu0 %822 }
 0x78e   :  { %v827_v44 = vmul.f32 0.03125, %v823_v42 }
 0x78f   :  { %v830_v47 = vadd.f32 1e-12, %v828_v41 }
 0x790   :  { %v829_v48 = vadd.f32 1e-12, %v827_v44 }
 0x791   :  { %2864 = vrsqrt.f32 %v830_v47 }
 0x792   :  { %2866 = vrsqrt.f32 %v829_v48 }
 0x79b   :  { %v2865_v53 = vpop.eup %2864 }
 0x79c   :  { %v2867_v55 = vpop.eup %2866  ;;  %v834_v56 = vmul.f32 %v2865_v53, %v818_v25 }
 0x79d   :  { %v833_v57 = vmul.f32 %v2867_v55, %v817_v27 }
 0x79e   :  { %v840_v59 = vmul.f32 %v838_v52, %v834_v56 }
 0x79f   :  { %v839_v60 = vmul.f32 %v838_v52, %v833_v57 }
 0x7a0   :  { %v846_v63 = vadd.f32 %v844_v58, %v840_v59 }
 0x7a1   :  { %v845_v62 = vadd.f32 %v844_v58, %v839_v60 }
 0x7a3   :  { %2592 = vmatprep.mubr.msk.f32.mxu0 %vm57_vm0, %v845_v62 }
 0x7a4   :  { %2593 = vmatmul.mubr.msk.f32.vlgmr.msra.gmra.mrb[10].mxu0 %vm57_vm0, %v846_v63 }
 0x877   :  { %v2594_v15 = vpop.f32.mrb[10].mxu0 }
 0x878   :  { %v936_v16 = vadd.f32 %v2594_v15, %v2360_v14  ;;  %v930_v17 = vpop.f32.mrb[11].mxu0 }
 0x879   :  { %v931_v18 = vadd.f32 %v2360_v14, %v930_v17  ;;  %v1087_v17 = vsub.s32 5, %v3061_v26 }
 0x87a   :  { %v942_v19 = vmul.f32 0.044715, %v936_v16  ;;  %v940_v33 = vmul.f32 0.5, %v936_v16 }
 0x87b   :  { %v941_v20 = vmul.f32 0.044715, %v931_v18  ;;  %v939_v40 = vmul.f32 0.5, %v931_v18 }
 0x87c   :  { %v944_v43 = vmul.f32 %v942_v19, %v936_v16 }
 0x87d   :  { %v943_v21 = vmul.f32 %v941_v20, %v931_v18 }
 0x87e   :  { %v946_v46 = vmul.f32 %v944_v43, %v936_v16 }
 0x87f   :  { %v945_v22 = vmul.f32 %v943_v21, %v931_v18 }
 0x880   :  { %v948_v23 = vadd.f32 %v946_v46, %v936_v16  ;;  %v1081_v16 = vsub.s32 4, %v3061_v26  ;;  %v1088_v46 = vrot.slane %v3211_v13, %v1087_v17  ;;  %v2077_v26 = vld [vmem:[%s3534_s3] sm:$0x3] }
 0x881   :  { %v947_v24 = vadd.f32 %v945_v22, %v931_v18 }
 0x882   :  { %v950_v25 = vmul.f32 0.7978846, %v948_v23  ;;  %v1082_v18 = vrot.slane %v3211_v13, %v1081_v16 }
 0x883   :  { %v949_v27 = vmul.f32 0.7978846, %v947_v24 }
 0x884   :  { %2868 = vtanh.f32 %v950_v25 }
 0x885   :  { %2870 = vtanh.f32 %v949_v27  ;;  %v2370_v27 = vld [vmem:[%s3537_s6 + $0x1] ss:$0 sm:$0xff] }
 0x88e   :  { %v2869_v29 = vpop.eup %2868 }
 0x88f   :  { %v2871_v31 = vpop.eup %2870  ;;  %v954_v32 = vadd.f32 1.0, %v2869_v29 }
 0x890   :  { %v953_v38 = vadd.f32 1.0, %v2871_v31 }
 0x891   :  { %v956_v35 = vmul.f32 %v954_v32, %v940_v33 }
 0x892   :  { %v955_v34 = vmul.f32 %v953_v38, %v939_v40 }
 0x894   :  { %2611 = vmatprep.mubr.msk.f32.mxu1 %vm969_vm2, %v955_v34 }
 0x895   :  { %2612 = vmatmul.mubr.msk.f32.vlgmr.msra.gmra.mrb[10].mxu1 %vm969_vm2, %v956_v35 }
 0x968   :  { %v2613_v39 = vpop.f32.mrb[10].mxu1 }
 0x969   :  { %v1048_v41 = vadd.f32 %v2613_v39, %v968_v37  ;;  %v1042_v42 = vpop.f32.mrb[11].mxu1 }
 0x96a   :  { %v1043_v44 = vadd.f32 %v1042_v42, %v968_v37 }
 0x96b   :  { %v1052_v47 = vadd.f32 %v1048_v41, %v846_v63 }
 0x96c   :  { %v1051_v48 = vadd.f32 %v1043_v44, %v845_v62  ;;  %v2365_v62 = vld [vmem:[%s3536_s5 + $0x20] sm:$0xff] }
 0x96d   :  { %v1056_v52 = vsel %vm57_vm0, %v1052_v47, 0.0  ;;  %v2767_v4 = vpack.c.bf16 %v2366_v3, %v2365_v62 }
 0x96e   :  { %1057 = vadd.xlane.f32.xlu1 %v1056_v52  ;;  %v1053_v53 = vsel %vm57_vm0, %v1051_v48, 0.0 }
 0x96f   :  { %1054 = vadd.xlane.f32.xlu0 %v1053_v53  ;;  %2768 = vmatprep.subr.bf16.mxu0 %v2767_v4 }
 0x970   :  { %2770 = vmatpush3.bf16.msra.mxu0 %v2767_v4 }
 0x971   :  { %2772 = vmatprep.subr.bf16.mxu0 %v2771_v8 }
 0x974   :  { %2774 = vmatpush3.bf16.msra.mxu0 %v2771_v8 }
 0x9fb   :  { %v1058_v55 = vpop.xlane.xlu1 %1057 }
 0x9fc   :  { %v1060_v56 = vmul.f32 0.03125, %v1058_v55  ;;  %v1055_v57 = vpop.xlane.xlu0 %1054 }
 0x9fd   :  { %v1059_v58 = vmul.f32 0.03125, %v1055_v57 }
 0x9fe   :  { %v1062_v59 = vsub.f32 %v1052_v47, %v1060_v56 }
 0x9ff   :  { %v1061_v60 = vsub.f32 %v1051_v48, %v1059_v58 }
 0xa00   :  { %v1064_v0 = vmul.f32 %v1062_v59, %v1062_v59 }
 0xa01   :  { %v1063_v1 = vmul.f32 %v1061_v60, %v1061_v60 }
 0xa02   :  { %v1068_v2 = vsel %vm57_vm0, %v1064_v0, 0.0 }
 0xa03   :  { %1069 = vadd.xlane.f32.xlu1 %v1068_v2  ;;  %v1065_v63 = vsel %vm57_vm0, %v1063_v1, 0.0 }
 0xa04   :  { %1066 = vadd.xlane.f32.xlu0 %v1065_v63 }
 0xa90   :  { %v1070_v9 = vpop.xlane.xlu1 %1069 }
 0xa91   :  { %v1072_v10 = vmul.f32 0.03125, %v1070_v9  ;;  %v1067_v11 = vpop.xlane.xlu0 %1066 }
 0xa92   :  { %v1071_v12 = vmul.f32 0.03125, %v1067_v11 }
 0xa93   :  { %v1074_v14 = vadd.f32 1e-12, %v1072_v10 }
 0xa94   :  { %v1073_v15 = vadd.f32 1e-12, %v1071_v12 }
 0xa95   :  { %2872 = vrsqrt.f32 %v1074_v14 }
 0xa96   :  { %2874 = vrsqrt.f32 %v1073_v15 }
 0xa9f   :  { %v2873_v19 = vpop.eup %2872 }
 0xaa0   :  { %v2875_v20 = vpop.eup %2874  ;;  %v1078_v43 = vmul.f32 %v2873_v19, %v1062_v59 }
 0xaa1   :  { %v1077_v21 = vmul.f32 %v2875_v20, %v1061_v60 }
 0xaa2   :  { %v1084_v22 = vmul.f32 %v1082_v18, %v1078_v43 }
 0xaa3   :  { %v1083_v23 = vmul.f32 %v1082_v18, %v1077_v21 }
 0xaa4   :  { %v3300_v25 = vadd.f32 %v1088_v46, %v1084_v22 }
 0xaa5   :  { %v3298_v24 = vadd.f32 %v1088_v46, %v1083_v23 }
 0xaa7   :  { %2622 = vmatprep.mubr.msk.f32.mxu0 %vm57_vm0, %v3298_v24 }
 0xaa8   :  { %2623 = vmatmul.mubr.msk.f32.vlgmr.msra.gmra.mrb[12].mxu0 %vm57_vm0, %v3300_v25 }
 0xb7b   :  { %v2624_v29 = vpop.f32.mrb[12].mxu0 }
 0xb7c   :  { %v3309_v31 = vadd.f32 %v2624_v29, %v2370_v27  ;;  %v1176_v13 = vpop.f32.mrb[13].mxu0 }
 0xb7d   :  { %v3311_v32 = vadd.f32 %v2370_v27, %v1176_v13 }
 0xb7e   :  { %1447 = vrot.lane.b32.xlu1 %v3309_v31, %s2948_s24  ;;  %v1442_v39 = vmul.f32 %v3309_v31, %v3090_v45  ;;  %v1443_v41 = vmul.f32 %v3309_v31, %v3104_v49  ;;  %v1444_v42 = vmul.f32 %v3309_v31, %v3110_v50  ;;  %v1445_v44 = vmul.f32 %v3309_v31, %v3121_v54 }
 0xb7f   :  { %1190 = vrot.lane.b32.xlu0 %v3311_v32, %s2948_s24  ;;  %v1185_v40 = vmul.f32 %v3311_v32, %v3090_v45  ;;  %v1186_v34 = vmul.f32 %v3311_v32, %v3104_v49  ;;  %v1187_v35 = vmul.f32 %v3311_v32, %v3110_v50  ;;  %v1188_v37 = vmul.f32 %v3311_v32, %v3121_v54 }
 0xb81   :  { %2627 = vmatprep.mubr.msk.f32.mxu0 %vm57_vm0, %v1185_v40 }
 0xbf0   :  { %v1448_v33 = vpop.permute.xlu1 %1447 }
 0xbf1   :  { %v1191_v38 = vpop.permute.xlu0 %1190 }
 0xbf2   :  { %2625 = vmatprep.subr.msk.mxu0 %vm57_vm0, %v1191_v38 }
 0xbf3   :  { %2626 = vmatpush3.xpose.msk.msra.mxu0 %vm57_vm0, %v1191_v38 }
 0xbf4   :  { %2641 = vmatprep.subr.msk.mxu0 %vm57_vm0, %v1448_v33 }
 0xbf6   :  { %2628 = vmatmul.mubr.msk.f32.vlgmr.msra.gmra.mrb[14].mxu0 %vm57_vm0, %v1186_v34 }
 0xbf7   :  { %2630 = vmatprep.mubr.msk.f32.mxu0 %vm57_vm0, %v1187_v35  ;;  %2642 = vmatpush3.xpose.msk.msra.mxu0 %vm57_vm0, %v1448_v33 }
 0xbfa   :  { %2631 = vmatmul.mubr.msk.f32.gmra.mrb[16].mxu0 %vm57_vm0, %v1188_v37 }
 0xbfb   :  { %2643 = vmatprep.mubr.msk.f32.mxu0 %vm57_vm0, %v1442_v39 }
 0xbfe   :  { %2644 = vmatmul.mubr.msk.f32.vlgmr.msra.gmra.mrb[18].mxu0 %vm57_vm0, %v1443_v41 }
 0xbff   :  { %2646 = vmatprep.mubr.msk.f32.mxu0 %vm57_vm0, %v1444_v42 }
 0xc02   :  { %2647 = vmatmul.mubr.msk.f32.gmra.mrb[20].mxu0 %vm57_vm0, %v1445_v44 }
 0xcc9   :  { %v2629_v45 = vpop.f32.mrb[14].mxu0 }
 0xcca   :  { %v1278_v47 = vadd.f32 %v2629_v45, %v3145_v61  ;;  %v1272_v48 = vpop.f32.mrb[15].mxu0 }
 0xccb   :  { %v1273_v52 = vadd.f32 %v1272_v48, %v3145_v61 }
 0xccc   :  { %v1294_v49 = vsel %vm304_vm1, %v1278_v47, -inf }
 0xccd   :  { %1295 = vmax.xlane.f32.xlu0 %v1294_v49  ;;  %v2632_v53 = vpop.f32.mrb[16].mxu0  ;;  %v1291_v50 = vsel %vm304_vm1, %v1273_v52, -inf }
 0xcce   :  { %v1288_v55 = vadd.f32 %v2632_v53, %v3145_v61  ;;  %v1282_v56 = vpop.f32.mrb[17].mxu0  ;;  %1292 = vmax.xlane.f32.xlu1 %v1291_v50 }
 0xccf   :  { %v1283_v54 = vadd.f32 %v1282_v56, %v3145_v61 }
 0xcd0   :  { %v1300_v57 = vsel %vm304_vm1, %v1288_v55, -inf }
 0xcd1   :  { %v2645_v58 = vpop.f32.mrb[18].mxu0  ;;  %v1297_v59 = vsel %vm304_vm1, %v1283_v54, -inf }
 0xcd2   :  { %v1535_v60 = vadd.f32 %v2645_v58, %v3152_v5  ;;  %v1529_v0 = vpop.f32.mrb[19].mxu0  ;;  %1298 = vmax.xlane.f32.xlu0 %v1297_v59  ;;  %1301 = vmax.xlane.f32.xlu1 %v1300_v57 }
 0xcd3   :  { %v1530_v1 = vadd.f32 %v1529_v0, %v3152_v5 }
 0xcd4   :  { %v1551_v2 = vsel %vm304_vm1, %v1535_v60, -inf }
 0xcd5   :  { %v2648_v63 = vpop.f32.mrb[20].mxu0  ;;  %v1548_v62 = vsel %vm304_vm1, %v1530_v1, -inf }
 0xcd6   :  { %v1545_v3 = vadd.f32 %v2648_v63, %v3152_v5  ;;  %v1539_v61 = vpop.f32.mrb[21].mxu0  ;;  %1549 = vmax.xlane.f32.xlu0 %v1548_v62  ;;  %1552 = vmax.xlane.f32.xlu1 %v1551_v2 }
 0xcd7   :  { %v1540_v4 = vadd.f32 %v1539_v61, %v3152_v5 }
 0xcd8   :  { %v1557_v6 = vsel %vm304_vm1, %v1545_v3, -inf }
 0xcd9   :  { %v1554_v7 = vsel %vm304_vm1, %v1540_v4, -inf }
 0xcda   :  { %1555 = vmax.xlane.f32.xlu0 %v1554_v7  ;;  %1558 = vmax.xlane.f32.xlu1 %v1557_v6 }
 0xd5a   :  { %v1296_v8 = vpop.xlane.xlu0 %1295 }
 0xd5b   :  { %v1304_v9 = vsub.f32 %v1278_v47, %v1296_v8  ;;  %v1293_v10 = vpop.xlane.xlu1 %1292 }
 0xd5c   :  { %v1303_v11 = vsub.f32 %v1273_v52, %v1293_v10 }
 0xd5d   :  { %v1309_v12 = vmul.f32 1.442695, %v1304_v9 }
 0xd5e   :  { %v1307_v14 = vmul.f32 1.442695, %v1303_v11 }
 0xd5f   :  { %2876 = vpow2.f32 %v1309_v12  ;;  %v1299_v15 = vpop.xlane.xlu0 %1298  ;;  %v1302_v18 = vpop.xlane.xlu1 %1301 }
 0xd60   :  { %2878 = vpow2.f32 %v1307_v14  ;;  %v1305_v19 = vsub.f32 %v1283_v54, %v1299_v15  ;;  %v1306_v20 = vsub.f32 %v1288_v55, %v1302_v18 }
 0xd62   :  { %v1311_v43 = vmul.f32 1.442695, %v1305_v19  ;;  %v1313_v5 = vmul.f32 1.442695, %v1306_v20 }
 0xd63   :  { %v1550_v21 = vpop.xlane.xlu0 %1549  ;;  %v1553_v46 = vpop.xlane.xlu1 %1552 }
 0xd64   :  { %2880 = vpow2.f32 %v1311_v43  ;;  %v1560_v22 = vsub.f32 %v1530_v1, %v1550_v21  ;;  %v1561_v23 = vsub.f32 %v1535_v60, %v1553_v46  ;;  %v2393_v21 = vld [vmem:[%s3538_s7 + $0x28] sm:$0xff] }
 0xd65   :  { %2882 = vpow2.f32 %v1313_v5  ;;  %v2392_v5 = vld [vmem:[%s3538_s7 + $0x20] sm:$0xff] }
 0xd66   :  { %v1564_v27 = vmul.f32 1.442695, %v1560_v22  ;;  %v1566_v29 = vmul.f32 1.442695, %v1561_v23  ;;  %v2775_v46 = vpack.c.bf16 %v2393_v21, %v2392_v5  ;;  %v2394_v22 = vld [vmem:[%s3538_s7 + $0x30] sm:$0xff]  ;;  %v2395_v23 = vld [vmem:[%s3538_s7 + $0x38] sm:$0xff] }
 0xd67   :  { %v1556_v13 = vpop.xlane.xlu0 %1555  ;;  %v1559_v40 = vpop.xlane.xlu1 %1558 }
 0xd68   :  { %2884 = vpow2.f32 %v1564_v27  ;;  %v1562_v38 = vsub.f32 %v1540_v4, %v1556_v13  ;;  %v1563_v33 = vsub.f32 %v1545_v3, %v1559_v40  ;;  %2776 = vmatprep.subr.bf16.mxu0 %v2775_v46  ;;  %v2779_v27 = vpack.c.bf16 %v2395_v23, %v2394_v22  ;;  %v2920_v13 = vld [vmem:[%s3533_s2 + $0x8] sm:$0xff] }
 0xd69   :  { %v2877_v34 = vpop.eup %2876  ;;  %2886 = vpow2.f32 %v1566_v29  ;;  %2778 = vmatpush3.bf16.msra.mxu0 %v2775_v46 }
 0xd6a   :  { %v2879_v35 = vpop.eup %2878  ;;  %v1568_v37 = vmul.f32 1.442695, %v1562_v38  ;;  %v1570_v39 = vmul.f32 1.442695, %v1563_v33  ;;  %v1318_v41 = vsel %vm304_vm1, %v2877_v34, 0.0  ;;  %2780 = vmatprep.subr.bf16.mxu0 %v2779_v27  ;;  %v2921_v33 = vld [vmem:[%s3533_s2] sm:$0xff] }
 0xd6b   :  { %1319 = vadd.xlane.f32.xlu1 %v1318_v41  ;;  %v1315_v42 = vsel %vm304_vm1, %v2879_v35, 0.0  ;;  %v2922_v41 = vld [vmem:[%s3533_s2 + $0x10] sm:$0xff] }
 0xd6c   :  { %2888 = vpow2.f32 %v1568_v37  ;;  %1316 = vadd.xlane.f32.xlu0 %v1315_v42 }
 0xd6d   :  { %2890 = vpow2.f32 %v1570_v39  ;;  %2782 = vmatpush3.bf16.msra.mxu0 %v2779_v27 }
 0xd6e   :  { %v2881_v44 = vpop.eup %2880 }
 0xd6f   :  { %v2883_v45 = vpop.eup %2882  ;;  %v1321_v47 = vsel %vm304_vm1, %v2881_v44, 0.0 }
 0xd70   :  { %1322 = vadd.xlane.f32.xlu0 %v1321_v47  ;;  %v1324_v48 = vsel %vm304_vm1, %v2883_v45, 0.0 }
 0xd71   :  { %1325 = vadd.xlane.f32.xlu1 %v1324_v48 }
 0xd72   :  { %v2885_v52 = vpop.eup %2884 }
 0xd73   :  { %v2887_v49 = vpop.eup %2886  ;;  %v1572_v53 = vsel %vm304_vm1, %v2885_v52, 0.0 }
 0xd74   :  { %1573 = vadd.xlane.f32.xlu0 %v1572_v53  ;;  %v1575_v50 = vsel %vm304_vm1, %v2887_v49, 0.0 }
 0xd75   :  { %1576 = vadd.xlane.f32.xlu1 %v1575_v50 }
 0xd76   :  { %v2889_v55 = vpop.eup %2888 }
 0xd77   :  { %v2891_v56 = vpop.eup %2890  ;;  %v1578_v54 = vsel %vm304_vm1, %v2889_v55, 0.0 }
 0xd78   :  { %1579 = vadd.xlane.f32.xlu0 %v1578_v54  ;;  %v1581_v57 = vsel %vm304_vm1, %v2891_v56, 0.0 }
 0xd79   :  { %1582 = vadd.xlane.f32.xlu1 %v1581_v57 }
 0xd8a   :  { %1592 = vrot.lane.b32.xlu1 %v3309_v31, %s2949_s1 }
 0xd8e   :  { %1335 = vrot.lane.b32.xlu0 %v3311_v32, %s2949_s1 }
 0xdf8   :  { %v1320_v58 = vpop.xlane.xlu1 %1319 }
 0xdf9   :  { %v1317_v59 = vpop.xlane.xlu0 %1316 }
 0xdfa   :  { %2892 = vrcp.f32 %v1317_v59 }
 0xdfb   :  { %2894 = vrcp.f32 %v1320_v58 }
 0xdfd   :  { %v1323_v60 = vpop.xlane.xlu0 %1322 }
 0xdfe   :  { %2896 = vrcp.f32 %v1323_v60  ;;  %v1326_v0 = vpop.xlane.xlu1 %1325 }
 0xdff   :  { %2898 = vrcp.f32 %v1326_v0  ;;  %v3410_v0 = vld [vmem:[%s3542_s11 + $0x8] sm:$0x3f] }
 0xe01   :  { %v1574_v1 = vpop.xlane.xlu0 %1573 }
 0xe02   :  { %2900 = vrcp.f32 %v1574_v1  ;;  %v1577_v2 = vpop.xlane.xlu1 %1576  ;;  %v1709_v1 = vrot.slane %v3410_v0, %v3064_v28 }
 0xe03   :  { %2902 = vrcp.f32 %v1577_v2 }
 0xe04   :  { %v2893_v63 = vpop.eup %2892 }
 0xe05   :  { %v1580_v62 = vpop.xlane.xlu0 %1579  ;;  %v1331_v3 = vmul.f32 %v2893_v63, %v2879_v35  ;;  %v2895_v61 = vpop.eup %2894 }
 0xe06   :  { %2904 = vrcp.f32 %v1580_v62  ;;  %v1583_v31 = vpop.xlane.xlu1 %1582  ;;  %v1332_v6 = vmul.f32 %v2895_v61, %v2877_v34 }
 0xe07   :  { %2635 = vmatprep.mubr.msk.f32.mxu1 %vm304_vm1, %v1331_v3  ;;  %2906 = vrcp.f32 %v1583_v31 }
 0xe08   :  { %v2897_v32 = vpop.eup %2896 }
 0xe09   :  { %v1336_v4 = vpop.permute.xlu0 %1335  ;;  %v2899_v7 = vpop.eup %2898  ;;  %v1333_v9 = vmul.f32 %v2897_v32, %v2881_v44  ;;  %v2923_v44 = vld [vmem:[%s3533_s2 + $0x18] sm:$0xff]  ;;  %s2329_s2 = sshll.u32 %s2953_s30, 4  ;;  %s2330_s2 = int_to_ptr.vmem [resolvable:$true] %s2329_s2 }
 0xe0a   :  { %2633 = vmatprep.subr.mxu1 %v1336_v4  ;;  %v1593_v8 = vpop.permute.xlu1 %1592  ;;  %v1334_v11 = vmul.f32 %v2899_v7, %v2883_v45  ;;  %p2929_p1 = scmp.lt.s32.totalorder %s2330_s2, %s2330_s2 }
 0xe0b   :  { %2634 = vmatpush3.msra.mxu1 %v1336_v4 }
 0xe0c   :  { %v2901_v10 = vpop.eup %2900  ;;  %2636 = vmatmul.mubr.msk.f32.vlgmr.msra.gmra.mrb[12].mxu1 %vm304_vm1, %v1332_v6  ;;  %2649 = vmatprep.subr.mxu1 %v1593_v8 }
 0xe0d   :  { %2638 = vmatprep.mubr.msk.f32.mxu1 %vm304_vm1, %v1333_v9  ;;  %2650 = vmatpush3.msra.mxu1 %v1593_v8  ;;  %v2903_v12 = vpop.eup %2902  ;;  %v1588_v14 = vmul.f32 %v2901_v10, %v2885_v52 }
 0xe0e   :  { %v1589_v18 = vmul.f32 %v2903_v12, %v2887_v49 }
 0xe10   :  { %v2905_v15 = vpop.eup %2904  ;;  %2639 = vmatmul.mubr.msk.f32.gmra.mrb[14].mxu1 %vm304_vm1, %v1334_v11 }
 0xe11   :  { %2651 = vmatprep.mubr.msk.f32.mxu1 %vm304_vm1, %v1588_v14  ;;  %v2907_v19 = vpop.eup %2906  ;;  %v1590_v20 = vmul.f32 %v2905_v15, %v2889_v55  ;;  %v2399_v15 = vld [vmem:[%s3539_s8 + $0x28] sm:$0xff] }
 0xe12   :  { %v1591_v43 = vmul.f32 %v2907_v19, %v2891_v56  ;;  %v2400_v19 = vld [vmem:[%s3539_s8 + $0x30] sm:$0xff] }
 0xe14   :  { %2652 = vmatmul.mubr.msk.f32.vlgmr.msra.gmra.mrb[16].mxu1 %vm304_vm1, %v1589_v18 }
 0xe15   :  { %2654 = vmatprep.mubr.msk.f32.mxu1 %vm304_vm1, %v1590_v20  ;;  %v2401_v20 = vld [vmem:[%s3539_s8 + $0x38] sm:$0xff] }
 0xe18   :  { %2655 = vmatmul.mubr.msk.f32.gmra.mrb[18].mxu1 %vm304_vm1, %v1591_v43  ;;  %v2787_v43 = vpack.c.bf16 %v2401_v20, %v2400_v19 }
 0xedf   :  { %v2637_v29 = vpop.f32.mrb[12].mxu1 }
 0xee0   :  { %v1436_v40 = vmul.f32 %v2920_v13, %v2637_v29  ;;  %v1416_v38 = vpop.f32.mrb[13].mxu1  ;;  %v1822_v29 = vrot.slane %v3410_v0, %v3070_v30  ;;  %v2406_v30 = vld [vmem:[%s3541_s10 + $0x40] sm:$0xff] }
 0xee1   :  { %v1435_v34 = vmul.f32 %v2921_v33, %v1416_v38 }
 0xee3   :  { %v1439_v35 = vadd.f32 %v1436_v40, %v1435_v34  ;;  %v2640_v37 = vpop.f32.mrb[14].mxu1  ;;  %v1828_v34 = vrot.slane %v3410_v0, %v843_v51  ;;  %v2408_v51 = vld [vmem:[%s3541_s10 + $0x50] sm:$0xff] }
 0xee4   :  { %v1426_v39 = vpop.f32.mrb[15].mxu1  ;;  %v1438_v45 = vmul.f32 %v2923_v44, %v2640_v37 }
 0xee5   :  { %v1437_v42 = vmul.f32 %v2922_v41, %v1426_v39 }
 0xee7   :  { %v1440_v47 = vadd.f32 %v1439_v35, %v1437_v42  ;;  %v2653_v48 = vpop.f32.mrb[16].mxu1  ;;  %v2407_v42 = vld [vmem:[%s3541_s10 + $0x48] sm:$0xff] }
 0xee8   :  { %v1693_v52 = vmul.f32 %v2920_v13, %v2653_v48  ;;  %v1673_v49 = vpop.f32.mrb[17].mxu1  ;;  %v2410_v48 = vld [vmem:[%s3541_s10 + $0x60] sm:$0xff] }
 0xee9   :  { %v1441_v53 = vadd.f32 %v1440_v47, %v1438_v45  ;;  %v1692_v50 = vmul.f32 %v2921_v33, %v1673_v49  ;;  %v2409_v45 = vld [vmem:[%s3541_s10 + $0x58] sm:$0xff] }
 0xeea   :  { %v2795_v47 = vpack.c.bf16 %v2409_v45, %v2408_v51 }
 0xeeb   :  { %v1696_v55 = vadd.f32 %v1693_v52, %v1692_v50  ;;  %v2656_v56 = vpop.f32.mrb[18].mxu1  ;;  %2665 = vmatprep.mubr.msk.f32.mxu0 %vm57_vm0, %v1441_v53  ;;  %v2411_v52 = vld [vmem:[%s3541_s10 + $0x68] sm:$0xff]  ;;  %v2412_v53 = vld [vmem:[%s3541_s10 + $0x70] sm:$0xff]  ;;  %v2413_v50 = vld [vmem:[%s3541_s10 + $0x78] sm:$0xff] }
 0xeec   :  { %v1683_v54 = vpop.f32.mrb[19].mxu1  ;;  %v1695_v58 = vmul.f32 %v2923_v44, %v2656_v56  ;;  %v2791_v44 = vpack.c.bf16 %v2407_v42, %v2406_v30  ;;  %v2799_v49 = vpack.c.bf16 %v2411_v52, %v2410_v48  ;;  %v2403_v56 = vld [vmem:[%s3540_s9 + $0x1] ss:$0 sm:$0xff]  ;;  %v2074_v48 = vrot.slane %v3410_v0, %v1087_v17 }
 0xeed   :  { %v1694_v57 = vmul.f32 %v2922_v41, %v1683_v54 }
 0xeee   :  { %2792 = vmatprep.subr.bf16.mxu0 %v2791_v44 }
 0xeef   :  { %v1697_v59 = vadd.f32 %v1696_v55, %v1694_v57  ;;  %v2803_v55 = vpack.c.bf16 %v2413_v50, %v2412_v53 }
 0xef1   :  { %v1698_v60 = vadd.f32 %v1697_v59, %v1695_v58 }
 0xef3   :  { %2666 = vmatmul.mubr.msk.f32.vlgmr.msra.gmra.mrb[22].mxu0 %vm57_vm0, %v1698_v60 }
 0xef4   :  { %2794 = vmatpush3.bf16.msra.mxu0 %v2791_v44  ;;  %v2068_v44 = vrot.slane %v3410_v0, %v1081_v16  ;;  %v2153_v16 = vld [vmem:[%s3543_s12 + $0x8] sm:$0xff] }
 0xef5   :  { %2796 = vmatprep.subr.bf16.mxu0 %v2795_v47 }
 0xef8   :  { %2798 = vmatpush3.bf16.msra.mxu0 %v2795_v47 }
 0xef9   :  { %2800 = vmatprep.subr.bf16.mxu0 %v2799_v49 }
 0xefc   :  { %2802 = vmatpush3.bf16.msra.mxu0 %v2799_v49 }
 0xefd   :  { %2804 = vmatprep.subr.bf16.mxu0 %v2803_v55 }
 0xf00   :  { %2806 = vmatpush3.bf16.msra.mxu0 %v2803_v55 }
 0xfc6   :  { %v2667_v2 = vpop.f32.mrb[22].mxu0 }
 0xfc7   :  { %v1788_v63 = vadd.f32 %v2667_v2, %v1709_v1  ;;  %v1782_v62 = vpop.f32.mrb[23].mxu0 }
 0xfc8   :  { %v1783_v3 = vadd.f32 %v1782_v62, %v1709_v1 }
 0xfc9   :  { %v1792_v31 = vadd.f32 %v1788_v63, %v3300_v25 }
 0xfca   :  { %v1791_v61 = vadd.f32 %v1783_v3, %v3298_v24  ;;  %v2398_v24 = vld [vmem:[%s3539_s8 + $0x20] sm:$0xff] }
 0xfcb   :  { %v1796_v32 = vsel %vm57_vm0, %v1792_v31, 0.0  ;;  %v2783_v18 = vpack.c.bf16 %v2399_v15, %v2398_v24 }
 0xfcc   :  { %1797 = vadd.xlane.f32.xlu0 %v1796_v32  ;;  %v1793_v4 = vsel %vm57_vm0, %v1791_v61, 0.0 }
 0xfcd   :  { %1794 = vadd.xlane.f32.xlu1 %v1793_v4  ;;  %2784 = vmatprep.subr.bf16.mxu1 %v2783_v18 }
 0xfce   :  { %2786 = vmatpush3.bf16.msra.mxu1 %v2783_v18 }
 0xfcf   :  { %2788 = vmatprep.subr.bf16.mxu1 %v2787_v43 }
 0xfd2   :  { %2790 = vmatpush3.bf16.msra.mxu1 %v2787_v43 }
0x1059   :  { %v1798_v6 = vpop.xlane.xlu0 %1797 }
0x105a   :  { %v1800_v7 = vmul.f32 0.03125, %v1798_v6  ;;  %v1795_v8 = vpop.xlane.xlu1 %1794 }
0x105b   :  { %v1799_v9 = vmul.f32 0.03125, %v1795_v8 }
0x105c   :  { %v1802_v10 = vsub.f32 %v1792_v31, %v1800_v7 }
0x105d   :  { %v1801_v28 = vsub.f32 %v1791_v61, %v1799_v9 }
0x105e   :  { %v1804_v11 = vmul.f32 %v1802_v10, %v1802_v10 }
0x105f   :  { %v1803_v12 = vmul.f32 %v1801_v28, %v1801_v28 }
0x1060   :  { %v1808_v14 = vsel %vm57_vm0, %v1804_v11, 0.0 }
0x1061   :  { %1809 = vadd.xlane.f32.xlu1 %v1808_v14  ;;  %v1805_v25 = vsel %vm57_vm0, %v1803_v12, 0.0  ;;  %v1955_v14 = vrot.slane %v3410_v0, %v967_v36  ;;  %v2154_v0 = vld [vmem:[%s3543_s12 + $0x10] sm:$0xff] }
0x1062   :  { %1806 = vadd.xlane.f32.xlu0 %v1805_v25 }
0x10ee   :  { %v1810_v5 = vpop.xlane.xlu1 %1809 }
0x10ef   :  { %v1812_v21 = vmul.f32 0.03125, %v1810_v5  ;;  %v1807_v46 = vpop.xlane.xlu0 %1806 }
0x10f0   :  { %v1811_v22 = vmul.f32 0.03125, %v1807_v46 }
0x10f1   :  { %v1814_v23 = vadd.f32 1e-12, %v1812_v21 }
0x10f2   :  { %v1813_v27 = vadd.f32 1e-12, %v1811_v22 }
0x10f3   :  { %2908 = vrsqrt.f32 %v1814_v23 }
0x10f4   :  { %2910 = vrsqrt.f32 %v1813_v27 }
0x10fd   :  { %v2909_v13 = vpop.eup %2908 }
0x10fe   :  { %v2911_v40 = vpop.eup %2910  ;;  %v1818_v38 = vmul.f32 %v2909_v13, %v1802_v10 }
0x10ff   :  { %v1817_v33 = vmul.f32 %v2911_v40, %v1801_v28 }
0x1100   :  { %v1824_v35 = vmul.f32 %v1822_v29, %v1818_v38 }
0x1101   :  { %v1823_v37 = vmul.f32 %v1822_v29, %v1817_v33  ;;  %v2950_v33 = vmov 0.0|0.0  }
0x1102   :  { %v1830_v41 = vadd.f32 %v1828_v34, %v1824_v35  ;;  %2807 = vmatprep.subr.bf16.mxu1 %v2950_v33 }
0x1103   :  { %v1829_v39 = vadd.f32 %v1828_v34, %v1823_v37  ;;  %v2952_v34 = vmov 0.0  }
0x1105   :  { %2676 = vmatprep.mubr.msk.f32.mxu1 %vm57_vm0, %v1829_v39 }
0x1106   :  { %2677 = vmatmul.mubr.msk.f32.vlgmr.msra.gmra.mrb[20].mxu1 %vm57_vm0, %v1830_v41 }
0x1107   :  { %2702 = vmatprep.mubr.msk.f32.mxu1 %vm2951_vm3, %v2952_v34 }
0x11d9   :  { %v2678_v54 = vpop.f32.mrb[20].mxu1 }
0x11da   :  { %v1922_v57 = vadd.f32 %v2678_v54, %v2403_v56  ;;  %v1916_v58 = vpop.f32.mrb[21].mxu1 }
0x11db   :  { %v1917_v59 = vadd.f32 %v2403_v56, %v1916_v58  ;;  %v2152_v56 = vld [vmem:[%s3543_s12] sm:$0xff] }
0x11dc   :  { %v1928_v60 = vmul.f32 0.044715, %v1922_v57  ;;  %v1926_v28 = vmul.f32 0.5, %v1922_v57  ;;  %v2811_v17 = vpack.c.bf16 %v2153_v16, %v2152_v56 }
0x11dd   :  { %v1927_v1 = vmul.f32 0.044715, %v1917_v59  ;;  %v1925_v9 = vmul.f32 0.5, %v1917_v59 }
0x11de   :  { %v1930_v2 = vmul.f32 %v1928_v60, %v1922_v57  ;;  %v2238_v60 = vld [vmem:[%s3545_s14 + $0x8] sm:$0xff] }
0x11df   :  { %v1929_v63 = vmul.f32 %v1927_v1, %v1917_v59 }
0x11e0   :  { %v1932_v62 = vmul.f32 %v1930_v2, %v1922_v57 }
0x11e1   :  { %v1931_v3 = vmul.f32 %v1929_v63, %v1917_v59 }
0x11e2   :  { %v1934_v31 = vadd.f32 %v1932_v62, %v1922_v57  ;;  %v2155_v57 = vld [vmem:[%s3543_s12 + $0x18] sm:$0xff]  ;;  %v2239_v62 = vld [vmem:[%s3545_s14 + $0x10] sm:$0xff] }
0x11e3   :  { %v1933_v61 = vadd.f32 %v1931_v3, %v1917_v59  ;;  %v2814_v58 = vpack.c.bf16 %v2155_v57, %v2154_v0  ;;  %v2237_v59 = vld [vmem:[%s3545_s14] sm:$0xff]  ;;  %v2240_v3 = vld [vmem:[%s3545_s14 + $0x18] sm:$0xff]  ;;  %s2924_s14 = scalar_lea.vmem %s2330_s2, 32 }
0x11e4   :  { %v1936_v32 = vmul.f32 0.7978846, %v1934_v31  ;;  %v2817_v1 = vpack.c.bf16 %v2238_v60, %v2237_v59  ;;  %v2820_v31 = vpack.c.bf16 %v2240_v3, %v2239_v62  ;;  %p2925_p0 = scmp.ne.s32.totalorder %s2330_s2, %s2924_s14  ;;  %p2930_p2 = scmp.lt.s32.totalorder %s2924_s14, %s2924_s14 }
0x11e5   :  { %v1935_v4 = vmul.f32 0.7978846, %v1933_v61  ;;  %v2417_v61 = vld [vmem:[%s3544_s13] ss:$0 sm:$0xff] }
0x11e6   :  { %2912 = vtanh.f32 %v1936_v32  ;;  %p2931_p3 = por %p2930_p2, %p2929_p1 }
0x11e7   :  { %2914 = vtanh.f32 %v1935_v4 }
0x11e8   :  { %p2932_p4 = pnand %p2931_p3, %p2925_p0 }
0x11f0   :  { %v2913_v6 = vpop.eup %2912 }
0x11f1   :  { %v2915_v7 = vpop.eup %2914  ;;  %v1940_v8 = vadd.f32 1.0, %v2913_v6 }
0x11f2   :  { %v1939_v10 = vadd.f32 1.0, %v2915_v7 }
0x11f3   :  { %v1942_v12 = vmul.f32 %v1940_v8, %v1926_v28  ;;  %v2419_v8 = vld [vmem:[%s3546_s15] ss:$0 sm:$0xff] }
0x11f4   :  { %v1941_v11 = vmul.f32 %v1939_v10, %v1925_v9 }
0x11f6   :  { %2695 = vmatprep.mubr.msk.f32.mxu0 %vm969_vm2, %v1941_v11 }
0x11f7   :  { %2696 = vmatmul.mubr.msk.f32.vlgmr.msra.gmra.mrb[24].mxu0 %vm969_vm2, %v1942_v12 }
0x12ca   :  { %v2697_v25 = vpop.f32.mrb[24].mxu0 }
0x12cb   :  { %v2034_v24 = vadd.f32 %v2697_v25, %v1955_v14  ;;  %v2028_v15 = vpop.f32.mrb[25].mxu0 }
0x12cc   :  { %v2029_v18 = vadd.f32 %v2028_v15, %v1955_v14 }
0x12cd   :  { %v2038_v19 = vadd.f32 %v2034_v24, %v1830_v41 }
0x12ce   :  { %v2037_v20 = vadd.f32 %v2029_v18, %v1829_v39 }
0x12cf   :  { %v2042_v43 = vsel %vm57_vm0, %v2038_v19, 0.0 }
0x12d0   :  { %2043 = vadd.xlane.f32.xlu1 %v2042_v43  ;;  %v2039_v5 = vsel %vm57_vm0, %v2037_v20, 0.0 }
0x12d1   :  { %2040 = vadd.xlane.f32.xlu0 %v2039_v5 }
0x135d   :  { %v2044_v21 = vpop.xlane.xlu1 %2043 }
0x135e   :  { %v2046_v46 = vmul.f32 0.03125, %v2044_v21  ;;  %v2041_v22 = vpop.xlane.xlu0 %2040 }
0x135f   :  { %v2045_v23 = vmul.f32 0.03125, %v2041_v22 }
0x1360   :  { %v2048_v27 = vsub.f32 %v2038_v19, %v2046_v46 }
0x1361   :  { %v2047_v29 = vsub.f32 %v2037_v20, %v2045_v23 }
0x1362   :  { %v2050_v13 = vmul.f32 %v2048_v27, %v2048_v27 }
0x1363   :  { %v2049_v36 = vmul.f32 %v2047_v29, %v2047_v29 }
0x1364   :  { %v2054_v40 = vsel %vm57_vm0, %v2050_v13, 0.0 }
0x1365   :  { %2055 = vadd.xlane.f32.xlu1 %v2054_v40  ;;  %v2051_v38 = vsel %vm57_vm0, %v2049_v36, 0.0 }
0x1366   :  { %2052 = vadd.xlane.f32.xlu0 %v2051_v38 }
0x13f2   :  { %v2056_v35 = vpop.xlane.xlu1 %2055 }
0x13f3   :  { %v2058_v37 = vmul.f32 0.03125, %v2056_v35  ;;  %v2053_v39 = vpop.xlane.xlu0 %2052 }
0x13f4   :  { %v2057_v41 = vmul.f32 0.03125, %v2053_v39 }
0x13f5   :  { %v2060_v30 = vadd.f32 1e-12, %v2058_v37 }
0x13f6   :  { %v2059_v42 = vadd.f32 1e-12, %v2057_v41 }
0x13f7   :  { %2916 = vrsqrt.f32 %v2060_v30 }
0x13f8   :  { %2918 = vrsqrt.f32 %v2059_v42 }
0x1401   :  { %v2917_v51 = vpop.eup %2916 }
0x1402   :  { %v2919_v45 = vpop.eup %2918  ;;  %v2064_v47 = vmul.f32 %v2917_v51, %v2048_v27 }
0x1403   :  { %v2063_v52 = vmul.f32 %v2919_v45, %v2047_v29 }
0x1404   :  { %v2070_v49 = vmul.f32 %v2068_v44, %v2064_v47 }
0x1405   :  { %v2069_v53 = vmul.f32 %v2068_v44, %v2063_v52 }
0x1406   :  { %v2076_v50 = vadd.f32 %v2074_v48, %v2070_v49 }
0x1407   :  { %v2075_v55 = vadd.f32 %v2074_v48, %v2069_v53 }
0x1409   :  { %v2808_v54 = vpack.c.bf16 %v2076_v50, %v2075_v55 }
0x140b   :  { %2809 = vmatpush3.bf16.msra.mxu1 %v2808_v54 }
0x140c   :  { %2810 = vmatprep.subr.bf16.mxu1 %v2950_v33 }
0x140e   :  { %2703 = vmatmul.mubr.msk.f32.vlgmr.msra.gmra.mrb[22].mxu1 %vm2078_vm4, %v2077_v26 }
0x140f   :  { %2812 = vmatpush3.bf16.msra.mxu1 %v2811_v17  ;;  %2713 = vmatprep.mubr.msk.f32.mxu1 %vm2951_vm3, %v2952_v34 }
0x1410   :  { %2813 = vmatprep.subr.bf16.mxu1 %v2950_v33 }
0x1413   :  { %2815 = vmatpush3.bf16.msra.mxu1 %v2814_v58 }
0x1414   :  { %2816 = vmatprep.subr.bf16.mxu1 %v2950_v33 }
0x14e1   :  { %v2148_v2 = vpop.f32.mrb[22].mxu1 }
0x14e2   :  { %v2704_v63 = vpop.f32.mrb[23].mxu1  ;;  %2714 = vmatmul.mubr.msk.f32.vlgmr.msra.gmra.mrb[24].mxu1 %vm57_vm0, %v2148_v2 }
0x14e3   :  { %2818 = vmatpush3.bf16.msra.mxu1 %v2817_v1  ;;  %2724 = vmatprep.mubr.msk.f32.mxu1 %vm2951_vm3, %v2952_v34 }
0x14e4   :  { %2819 = vmatprep.subr.bf16.mxu1 %v2950_v33 }
0x14e7   :  { %2821 = vmatpush3.bf16.msra.mxu1 %v2820_v31 }
0x15b5   :  { %v2232_v32 = vpop.f32.mrb[24].mxu1 }
0x15b6   :  { %v2233_v4 = vadd.f32 %v2417_v61, %v2232_v32  ;;  %v2715_v6 = vpop.f32.mrb[25].mxu1 }
0x15b8   :  { %v2236_v7 = vmax.f32 %v2233_v4, 0.0 }
0x15ba   :  { %2725 = vmatmul.mubr.msk.f32.vlgmr.msra.gmra.mrb[26].mxu1 %vm57_vm0, %v2236_v7 }
0x168d   :  { %v2317_v9 = vpop.f32.mrb[26].mxu1 }
0x168e   :  { %v2318_v10 = vadd.f32 %v2419_v8, %v2317_v9  ;;  %v2726_v28 = vpop.f32.mrb[27].mxu1 }
0x1690   :  { %2322 = vst.msk [vmem:[#allocation2] sm:$0x3] %vm2321_vm5, %v2318_v10 }
0x1691   :  { %2935 = shalt.err (!%p2932_p4)
}
0x1692   :  { %s2936_s0 = scalar_lea.hbm %s3547_s16, 32 }
0x1693   :  { %p2937_p5 = scmp.ne.s32.totalorder %s3547_s16, %s2936_s0  ;;  %p2940_p6 = scmp.lt.u32.totalorder %s2936_s0, %s3547_s16 }
0x1695   :  { %p2942_p7 = pnand %p2940_p6, %p2937_p5 }
0x1697   :  { %2945 = shalt.err (!%p2942_p7)
}
0x1698   :  { %2332 = dma.vmem_to_hbm [thread:$0]  %s2330_s2, 32, %s3547_s16, [#allocation3]  }
0x1699   :  { %2946 = dma.done.wait [#allocation3], 32  }
0x169a   :  { %2947 = vsyncadd [#allocation3], 4294967264 }
0x169b   :  { %2336 = vsyncpa [#allocation3], 1 }

</bundles_post_ra>
